<compile_context>
chip_gen: v5e
topology: v5e:2x2
jax: 0.10.0
libtpu: 0.0.40
codegen_flags: <defaults>
</compile_context>

<pallas_src>
import jax
import jax.numpy as jnp
from jax import lax
from jax.experimental import pallas as pl
from jax.experimental.pallas import tpu as pltpu


# ---------------------------------------------------------------------------
# The single fused kernel
# ---------------------------------------------------------------------------
def _noconvblock_kernel(q_ref, cp_ref, d_ref, o_ref):
    # q_ref : (4, 4, B, 7, 7) VMEM   q[u, v, n, i, j] = x[n, 2i+u, 2j+v]
    # cp_ref: (97,)           SMEM   [w1(18) | b1(2) | w2(72) | b2(4) | b4(1)]
    # d_ref : (18, 4)         VMEM   rows 0..15 = w3.T, row 16 = b3, row 17 = w4
    # o_ref : (B, 1)          VMEM
    w1 = [cp_ref[i] for i in range(18)]            # Conv1 weights, co*9 + di*3 + dj
    b1 = [cp_ref[18 + i] for i in range(2)]
    w2 = [cp_ref[20 + i] for i in range(72)]       # Conv2 weights, co*18 + ci*9 + di*3 + dj
    b2 = [cp_ref[92 + i] for i in range(4)]
    b4 = cp_ref[96]

    def sigmoid(z):                                # exact sigmoid via a single EUP tanh
        return 0.5 * (jnp.tanh(0.5 * z) + 1.0)

    q = q_ref[...]                                 # (4, 4, B, 7, 7)

    # ---- Conv2d(1,2,3) + MaxPool2d(2): pool offsets packed on the leading axes ----
    # q[di:di+2, dj:dj+2][a,b,n,i,j] = x[n, 2i+a+di, 2j+b+dj]  -> one FMA covers all
    # four pool offsets of both spatial dims; 18 FMA ops total instead of 72.
    acc1 = [None, None]
    for di in range(3):
        for dj in range(3):
            blk = q[di:di + 2, dj:dj + 2]          # (2, 2, B, 7, 7), free leading-dim view
            for co in range(2):
                t = w1[co * 9 + di * 3 + dj] * blk
                acc1[co] = t if acc1[co] is None else acc1[co] + t
    pooled1 = []
    for co in range(2):
        a = acc1[co]
        m = jnp.maximum(jnp.maximum(a[0, 0], a[0, 1]),
                        jnp.maximum(a[1, 0], a[1, 1]))        # pool BEFORE sigmoid (monotone)
        pooled1.append(sigmoid(m + b1[co]))                   # (B, 7, 7)

    # ---- Conv2d(2,4,3): only the 4x4 output region that survives MaxPool2d(2) ------
    acc2 = [None] * 4
    for ci in range(2):
        for di in range(3):
            for dj in range(3):
                blk = pooled1[ci][:, di:di + 4, dj:dj + 4]    # (B, 4, 4)
                for co in range(4):
                    t = w2[co * 18 + ci * 9 + di * 3 + dj] * blk
                    acc2[co] = t if acc2[co] is None else acc2[co] + t

    # ---- MaxPool2d(2) (floor) + Flatten (NCHW order), then ONE sigmoid ---------------
    pre = []                                       # 16 x (B,1,1), order c*4 + ph*2 + pw
    for co in range(4):
        a = acc2[co] + b2[co]
        ra = jnp.maximum(a[:, 0:1, :], a[:, 1:2, :])          # (B,1,4)  ph = 0
        rb = jnp.maximum(a[:, 2:3, :], a[:, 3:4, :])          # (B,1,4)  ph = 1
        for r in (ra, rb):
            pre.append(jnp.maximum(r[:, :, 0:1], r[:, :, 1:2]))   # pw = 0
            pre.append(jnp.maximum(r[:, :, 2:3], r[:, :, 3:4]))   # pw = 1
    feats = sigmoid(jnp.concatenate(pre, axis=1))             # (B, 16, 1), single EUP call

    # ---- Linear(16,4)+ReLU and Linear(4,1)+ReLU on the VPU (broadcast + reduce) ------
    d = d_ref[...]
    w3t = d[0:16, :]                                          # (16, 4) = torch w3.T
    b3 = d[16:17, :]                                          # (1, 4)
    w4r = d[17:18, :]                                         # (1, 4)
    y3 = jnp.maximum(jnp.sum(feats * w3t[None, :, :], axis=1) + b3, 0.0)   # (B, 4)
    y4 = jnp.sum(y3 * w4r, axis=1, keepdims=True) + b4                     # (B, 1)
    o_ref[...] = jnp.maximum(y4, 0.0)


# ---------------------------------------------------------------------------
# One-time parameter packing ("at init") + tiny per-call wrapper
# ---------------------------------------------------------------------------
def pack_params(p):
    """Pack all module parameters ONCE into the two kernel-resident buffers."""
    f32 = jnp.float32
    conv_vec = jnp.concatenate([
        jnp.asarray(p["w1"], f32).reshape(-1),     # 18  Conv2d(1,2,3) weight (OIHW flat)
        jnp.asarray(p["b1"], f32).reshape(-1),     # 2
        jnp.asarray(p["w2"], f32).reshape(-1),     # 72  Conv2d(2,4,3) weight (OIHW flat)
        jnp.asarray(p["b2"], f32).reshape(-1),     # 4
        jnp.asarray(p["b4"], f32).reshape(-1),     # 1
    ])                                             # (97,)
    dense_mat = jnp.concatenate([
        jnp.asarray(p["w3"], f32).T,               # (16, 4)
        jnp.asarray(p["b3"], f32).reshape(1, 4),
        jnp.asarray(p["w4"], f32).reshape(1, 4),
    ], axis=0)                                     # (18, 4)
    return conv_vec, dense_mat


def noconvblock_forward(x_nchw, conv_vec, dense_mat):
    B = x_nchw.shape[0]
    x = x_nchw[:, 0, :, :].astype(jnp.float32)     # (B, 16, 16); Cin == 1
    # Pre-pack all 16 conv1 tap / pool-offset windows (one small XLA gather fusion on a
    # 2 KB tensor) so the kernel never materializes shifted slice copies for conv1.
    q = jnp.stack([jnp.stack([x[:, u:u + 13:2, v:v + 13:2] for v in range(4)], axis=0)
                   for u in range(4)], axis=0)     # (4, 4, B, 7, 7)

    vmem = pl.BlockSpec(memory_space=pltpu.MemorySpace.VMEM)
    smem = pl.BlockSpec(memory_space=pltpu.MemorySpace.SMEM)
    return pl.pallas_call(
        _noconvblock_kernel,
        out_shape=jax.ShapeDtypeStruct((B, 1), jnp.float32),
        in_specs=[vmem, smem, vmem],
        out_specs=vmem,
    )(q, conv_vec, dense_mat)


# ---------------------------------------------------------------------------
# Pure-JAX reference (correctness check only)
# ---------------------------------------------------------------------------
def reference_forward(x, p):
    dn = ("NCHW", "OIHW", "NCHW")
    hi = lax.Precision.HIGHEST
    y = lax.conv_general_dilated(x, p["w1"], (1, 1), "VALID",
                                 dimension_numbers=dn, precision=hi)
    y = jax.nn.sigmoid(y + p["b1"].reshape(1, -1, 1, 1))
    y = lax.reduce_window(y, -jnp.inf, lax.max, (1, 1, 2, 2), (1, 1, 2, 2), "VALID")
    y = lax.conv_general_dilated(y, p["w2"], (1, 1), "VALID",
                                 dimension_numbers=dn, precision=hi)
    y = jax.nn.sigmoid(y + p["b2"].reshape(1, -1, 1, 1))
    y = lax.reduce_window(y, -jnp.inf, lax.max, (1, 1, 2, 2), (1, 1, 2, 2), "VALID")
    y = y.reshape(y.shape[0], -1)
    y = jnp.maximum(jnp.dot(y, p["w3"].T, precision=hi) + p["b3"], 0.0)
    y = jnp.maximum(jnp.dot(y, p["w4"].T, precision=hi) + p["b4"], 0.0)
    return y


if __name__ == "__main__":
    key = jax.random.PRNGKey(0)
    ks = jax.random.split(key, 9)
    params = {
        # torch layouts: Conv2d weight (Cout, Cin, KH, KW); Linear weight (out, in)
        "w1": jax.random.normal(ks[0], (2, 1, 3, 3), jnp.float32) * 0.3,
        "b1": jax.random.normal(ks[1], (2,), jnp.float32) * 0.1,
        "w2": jax.random.normal(ks[2], (4, 2, 3, 3), jnp.float32) * 0.3,
        "b2": jax.random.normal(ks[3], (4,), jnp.float32) * 0.1,
        "w3": jax.random.normal(ks[4], (4, 16), jnp.float32) * 0.25,
        "b3": jax.random.normal(ks[5], (4,), jnp.float32) * 0.1,
        "w4": jax.random.normal(ks[6], (1, 4), jnp.float32) * 0.25,
        "b4": jax.random.normal(ks[7], (1,), jnp.float32) * 0.1,
    }
    x = jax.random.normal(ks[8], (2, 1, 16, 16), jnp.float32)

    conv_vec, dense_mat = pack_params(params)          # packed once at "init"
    fwd = jax.jit(noconvblock_forward)
    out = jax.block_until_ready(fwd(x, conv_vec, dense_mat))

    ref = jax.block_until_ready(reference_forward(x, params))
    assert out.shape == (2, 1), out.shape
    assert jnp.allclose(out, ref, atol=5e-3, rtol=5e-3), (out, ref)

    print("KERNEL_OK")
</pallas_src>

<mosaic_0001>
module attributes {stable_mosaic.version = 11 : i64} {
  func.func @_noconvblock_kernel(%arg0: memref<4x4x2x7x7xf32, #tpu.memory_space<vmem>>, %arg1: memref<97xf32, #tpu.memory_space<smem>>, %arg2: memref<18x4xf32, #tpu.memory_space<vmem>>, %arg3: memref<2x1xf32, #tpu.memory_space<vmem>>) attributes {dimension_semantics = [], scalar_prefetch = 0 : i64, scratch_operands = 0 : i64, tpu.core_type = #tpu.core_type<tc>} {
    %c0 = arith.constant 0 : index
    %0 = memref.load %arg1[%c0] : memref<97xf32, #tpu.memory_space<smem>>
    %c1 = arith.constant 1 : index
    %1 = memref.load %arg1[%c1] : memref<97xf32, #tpu.memory_space<smem>>
    %c2 = arith.constant 2 : index
    %2 = memref.load %arg1[%c2] : memref<97xf32, #tpu.memory_space<smem>>
    %c3 = arith.constant 3 : index
    %3 = memref.load %arg1[%c3] : memref<97xf32, #tpu.memory_space<smem>>
    %c4 = arith.constant 4 : index
    %4 = memref.load %arg1[%c4] : memref<97xf32, #tpu.memory_space<smem>>
    %c5 = arith.constant 5 : index
    %5 = memref.load %arg1[%c5] : memref<97xf32, #tpu.memory_space<smem>>
    %c6 = arith.constant 6 : index
    %6 = memref.load %arg1[%c6] : memref<97xf32, #tpu.memory_space<smem>>
    %c7 = arith.constant 7 : index
    %7 = memref.load %arg1[%c7] : memref<97xf32, #tpu.memory_space<smem>>
    %c8 = arith.constant 8 : index
    %8 = memref.load %arg1[%c8] : memref<97xf32, #tpu.memory_space<smem>>
    %c9 = arith.constant 9 : index
    %9 = memref.load %arg1[%c9] : memref<97xf32, #tpu.memory_space<smem>>
    %c10 = arith.constant 10 : index
    %10 = memref.load %arg1[%c10] : memref<97xf32, #tpu.memory_space<smem>>
    %c11 = arith.constant 11 : index
    %11 = memref.load %arg1[%c11] : memref<97xf32, #tpu.memory_space<smem>>
    %c12 = arith.constant 12 : index
    %12 = memref.load %arg1[%c12] : memref<97xf32, #tpu.memory_space<smem>>
    %c13 = arith.constant 13 : index
    %13 = memref.load %arg1[%c13] : memref<97xf32, #tpu.memory_space<smem>>
    %c14 = arith.constant 14 : index
    %14 = memref.load %arg1[%c14] : memref<97xf32, #tpu.memory_space<smem>>
    %c15 = arith.constant 15 : index
    %15 = memref.load %arg1[%c15] : memref<97xf32, #tpu.memory_space<smem>>
    %c16 = arith.constant 16 : index
    %16 = memref.load %arg1[%c16] : memref<97xf32, #tpu.memory_space<smem>>
    %c17 = arith.constant 17 : index
    %17 = memref.load %arg1[%c17] : memref<97xf32, #tpu.memory_space<smem>>
    %c18 = arith.constant 18 : index
    %18 = memref.load %arg1[%c18] : memref<97xf32, #tpu.memory_space<smem>>
    %c19 = arith.constant 19 : index
    %19 = memref.load %arg1[%c19] : memref<97xf32, #tpu.memory_space<smem>>
    %c20 = arith.constant 20 : index
    %20 = memref.load %arg1[%c20] : memref<97xf32, #tpu.memory_space<smem>>
    %c21 = arith.constant 21 : index
    %21 = memref.load %arg1[%c21] : memref<97xf32, #tpu.memory_space<smem>>
    %c22 = arith.constant 22 : index
    %22 = memref.load %arg1[%c22] : memref<97xf32, #tpu.memory_space<smem>>
    %c23 = arith.constant 23 : index
    %23 = memref.load %arg1[%c23] : memref<97xf32, #tpu.memory_space<smem>>
    %c24 = arith.constant 24 : index
    %24 = memref.load %arg1[%c24] : memref<97xf32, #tpu.memory_space<smem>>
    %c25 = arith.constant 25 : index
    %25 = memref.load %arg1[%c25] : memref<97xf32, #tpu.memory_space<smem>>
    %c26 = arith.constant 26 : index
    %26 = memref.load %arg1[%c26] : memref<97xf32, #tpu.memory_space<smem>>
    %c27 = arith.constant 27 : index
    %27 = memref.load %arg1[%c27] : memref<97xf32, #tpu.memory_space<smem>>
    %c28 = arith.constant 28 : index
    %28 = memref.load %arg1[%c28] : memref<97xf32, #tpu.memory_space<smem>>
    %c29 = arith.constant 29 : index
    %29 = memref.load %arg1[%c29] : memref<97xf32, #tpu.memory_space<smem>>
    %c30 = arith.constant 30 : index
    %30 = memref.load %arg1[%c30] : memref<97xf32, #tpu.memory_space<smem>>
    %c31 = arith.constant 31 : index
    %31 = memref.load %arg1[%c31] : memref<97xf32, #tpu.memory_space<smem>>
    %c32 = arith.constant 32 : index
    %32 = memref.load %arg1[%c32] : memref<97xf32, #tpu.memory_space<smem>>
    %c33 = arith.constant 33 : index
    %33 = memref.load %arg1[%c33] : memref<97xf32, #tpu.memory_space<smem>>
    %c34 = arith.constant 34 : index
    %34 = memref.load %arg1[%c34] : memref<97xf32, #tpu.memory_space<smem>>
    %c35 = arith.constant 35 : index
    %35 = memref.load %arg1[%c35] : memref<97xf32, #tpu.memory_space<smem>>
    %c36 = arith.constant 36 : index
    %36 = memref.load %arg1[%c36] : memref<97xf32, #tpu.memory_space<smem>>
    %c37 = arith.constant 37 : index
    %37 = memref.load %arg1[%c37] : memref<97xf32, #tpu.memory_space<smem>>
    %c38 = arith.constant 38 : index
    %38 = memref.load %arg1[%c38] : memref<97xf32, #tpu.memory_space<smem>>
    %c39 = arith.constant 39 : index
    %39 = memref.load %arg1[%c39] : memref<97xf32, #tpu.memory_space<smem>>
    %c40 = arith.constant 40 : index
    %40 = memref.load %arg1[%c40] : memref<97xf32, #tpu.memory_space<smem>>
    %c41 = arith.constant 41 : index
    %41 = memref.load %arg1[%c41] : memref<97xf32, #tpu.memory_space<smem>>
    %c42 = arith.constant 42 : index
    %42 = memref.load %arg1[%c42] : memref<97xf32, #tpu.memory_space<smem>>
    %c43 = arith.constant 43 : index
    %43 = memref.load %arg1[%c43] : memref<97xf32, #tpu.memory_space<smem>>
    %c44 = arith.constant 44 : index
    %44 = memref.load %arg1[%c44] : memref<97xf32, #tpu.memory_space<smem>>
    %c45 = arith.constant 45 : index
    %45 = memref.load %arg1[%c45] : memref<97xf32, #tpu.memory_space<smem>>
    %c46 = arith.constant 46 : index
    %46 = memref.load %arg1[%c46] : memref<97xf32, #tpu.memory_space<smem>>
    %c47 = arith.constant 47 : index
    %47 = memref.load %arg1[%c47] : memref<97xf32, #tpu.memory_space<smem>>
    %c48 = arith.constant 48 : index
    %48 = memref.load %arg1[%c48] : memref<97xf32, #tpu.memory_space<smem>>
    %c49 = arith.constant 49 : index
    %49 = memref.load %arg1[%c49] : memref<97xf32, #tpu.memory_space<smem>>
    %c50 = arith.constant 50 : index
    %50 = memref.load %arg1[%c50] : memref<97xf32, #tpu.memory_space<smem>>
    %c51 = arith.constant 51 : index
    %51 = memref.load %arg1[%c51] : memref<97xf32, #tpu.memory_space<smem>>
    %c52 = arith.constant 52 : index
    %52 = memref.load %arg1[%c52] : memref<97xf32, #tpu.memory_space<smem>>
    %c53 = arith.constant 53 : index
    %53 = memref.load %arg1[%c53] : memref<97xf32, #tpu.memory_space<smem>>
    %c54 = arith.constant 54 : index
    %54 = memref.load %arg1[%c54] : memref<97xf32, #tpu.memory_space<smem>>
    %c55 = arith.constant 55 : index
    %55 = memref.load %arg1[%c55] : memref<97xf32, #tpu.memory_space<smem>>
    %c56 = arith.constant 56 : index
    %56 = memref.load %arg1[%c56] : memref<97xf32, #tpu.memory_space<smem>>
    %c57 = arith.constant 57 : index
    %57 = memref.load %arg1[%c57] : memref<97xf32, #tpu.memory_space<smem>>
    %c58 = arith.constant 58 : index
    %58 = memref.load %arg1[%c58] : memref<97xf32, #tpu.memory_space<smem>>
    %c59 = arith.constant 59 : index
    %59 = memref.load %arg1[%c59] : memref<97xf32, #tpu.memory_space<smem>>
    %c60 = arith.constant 60 : index
    %60 = memref.load %arg1[%c60] : memref<97xf32, #tpu.memory_space<smem>>
    %c61 = arith.constant 61 : index
    %61 = memref.load %arg1[%c61] : memref<97xf32, #tpu.memory_space<smem>>
    %c62 = arith.constant 62 : index
    %62 = memref.load %arg1[%c62] : memref<97xf32, #tpu.memory_space<smem>>
    %c63 = arith.constant 63 : index
    %63 = memref.load %arg1[%c63] : memref<97xf32, #tpu.memory_space<smem>>
    %c64 = arith.constant 64 : index
    %64 = memref.load %arg1[%c64] : memref<97xf32, #tpu.memory_space<smem>>
    %c65 = arith.constant 65 : index
    %65 = memref.load %arg1[%c65] : memref<97xf32, #tpu.memory_space<smem>>
    %c66 = arith.constant 66 : index
    %66 = memref.load %arg1[%c66] : memref<97xf32, #tpu.memory_space<smem>>
    %c67 = arith.constant 67 : index
    %67 = memref.load %arg1[%c67] : memref<97xf32, #tpu.memory_space<smem>>
    %c68 = arith.constant 68 : index
    %68 = memref.load %arg1[%c68] : memref<97xf32, #tpu.memory_space<smem>>
    %c69 = arith.constant 69 : index
    %69 = memref.load %arg1[%c69] : memref<97xf32, #tpu.memory_space<smem>>
    %c70 = arith.constant 70 : index
    %70 = memref.load %arg1[%c70] : memref<97xf32, #tpu.memory_space<smem>>
    %c71 = arith.constant 71 : index
    %71 = memref.load %arg1[%c71] : memref<97xf32, #tpu.memory_space<smem>>
    %c72 = arith.constant 72 : index
    %72 = memref.load %arg1[%c72] : memref<97xf32, #tpu.memory_space<smem>>
    %c73 = arith.constant 73 : index
    %73 = memref.load %arg1[%c73] : memref<97xf32, #tpu.memory_space<smem>>
    %c74 = arith.constant 74 : index
    %74 = memref.load %arg1[%c74] : memref<97xf32, #tpu.memory_space<smem>>
    %c75 = arith.constant 75 : index
    %75 = memref.load %arg1[%c75] : memref<97xf32, #tpu.memory_space<smem>>
    %c76 = arith.constant 76 : index
    %76 = memref.load %arg1[%c76] : memref<97xf32, #tpu.memory_space<smem>>
    %c77 = arith.constant 77 : index
    %77 = memref.load %arg1[%c77] : memref<97xf32, #tpu.memory_space<smem>>
    %c78 = arith.constant 78 : index
    %78 = memref.load %arg1[%c78] : memref<97xf32, #tpu.memory_space<smem>>
    %c79 = arith.constant 79 : index
    %79 = memref.load %arg1[%c79] : memref<97xf32, #tpu.memory_space<smem>>
    %c80 = arith.constant 80 : index
    %80 = memref.load %arg1[%c80] : memref<97xf32, #tpu.memory_space<smem>>
    %c81 = arith.constant 81 : index
    %81 = memref.load %arg1[%c81] : memref<97xf32, #tpu.memory_space<smem>>
    %c82 = arith.constant 82 : index
    %82 = memref.load %arg1[%c82] : memref<97xf32, #tpu.memory_space<smem>>
    %c83 = arith.constant 83 : index
    %83 = memref.load %arg1[%c83] : memref<97xf32, #tpu.memory_space<smem>>
    %c84 = arith.constant 84 : index
    %84 = memref.load %arg1[%c84] : memref<97xf32, #tpu.memory_space<smem>>
    %c85 = arith.constant 85 : index
    %85 = memref.load %arg1[%c85] : memref<97xf32, #tpu.memory_space<smem>>
    %c86 = arith.constant 86 : index
    %86 = memref.load %arg1[%c86] : memref<97xf32, #tpu.memory_space<smem>>
    %c87 = arith.constant 87 : index
    %87 = memref.load %arg1[%c87] : memref<97xf32, #tpu.memory_space<smem>>
    %c88 = arith.constant 88 : index
    %88 = memref.load %arg1[%c88] : memref<97xf32, #tpu.memory_space<smem>>
    %c89 = arith.constant 89 : index
    %89 = memref.load %arg1[%c89] : memref<97xf32, #tpu.memory_space<smem>>
    %c90 = arith.constant 90 : index
    %90 = memref.load %arg1[%c90] : memref<97xf32, #tpu.memory_space<smem>>
    %c91 = arith.constant 91 : index
    %91 = memref.load %arg1[%c91] : memref<97xf32, #tpu.memory_space<smem>>
    %c92 = arith.constant 92 : index
    %92 = memref.load %arg1[%c92] : memref<97xf32, #tpu.memory_space<smem>>
    %c93 = arith.constant 93 : index
    %93 = memref.load %arg1[%c93] : memref<97xf32, #tpu.memory_space<smem>>
    %c94 = arith.constant 94 : index
    %94 = memref.load %arg1[%c94] : memref<97xf32, #tpu.memory_space<smem>>
    %c95 = arith.constant 95 : index
    %95 = memref.load %arg1[%c95] : memref<97xf32, #tpu.memory_space<smem>>
    %c96 = arith.constant 96 : index
    %96 = memref.load %arg1[%c96] : memref<97xf32, #tpu.memory_space<smem>>
    %c0_0 = arith.constant 0 : index
    %c0_1 = arith.constant 0 : index
    %c0_2 = arith.constant 0 : index
    %c0_3 = arith.constant 0 : index
    %c0_4 = arith.constant 0 : index
    %97 = vector.load %arg0[%c0_0, %c0_1, %c0_2, %c0_3, %c0_4] : memref<4x4x2x7x7xf32, #tpu.memory_space<vmem>>, vector<4x4x2x7x7xf32>
    %98 = vector.extract_strided_slice %97 {offsets = [0, 0, 0, 0, 0], sizes = [2, 2, 2, 7, 7], strides = [1, 1, 1, 1, 1]} : vector<4x4x2x7x7xf32> to vector<2x2x2x7x7xf32>
    %99 = vector.broadcast %0 : f32 to vector<2x2x2x7x7xf32>
    %100 = arith.mulf %99, %98 : vector<2x2x2x7x7xf32>
    %101 = vector.broadcast %9 : f32 to vector<2x2x2x7x7xf32>
    %102 = arith.mulf %101, %98 : vector<2x2x2x7x7xf32>
    %103 = vector.extract_strided_slice %97 {offsets = [0, 1, 0, 0, 0], sizes = [2, 2, 2, 7, 7], strides = [1, 1, 1, 1, 1]} : vector<4x4x2x7x7xf32> to vector<2x2x2x7x7xf32>
    %104 = vector.broadcast %1 : f32 to vector<2x2x2x7x7xf32>
    %105 = arith.mulf %104, %103 : vector<2x2x2x7x7xf32>
    %106 = arith.addf %100, %105 : vector<2x2x2x7x7xf32>
    %107 = vector.broadcast %10 : f32 to vector<2x2x2x7x7xf32>
    %108 = arith.mulf %107, %103 : vector<2x2x2x7x7xf32>
    %109 = arith.addf %102, %108 : vector<2x2x2x7x7xf32>
    %110 = vector.extract_strided_slice %97 {offsets = [0, 2, 0, 0, 0], sizes = [2, 2, 2, 7, 7], strides = [1, 1, 1, 1, 1]} : vector<4x4x2x7x7xf32> to vector<2x2x2x7x7xf32>
    %111 = vector.broadcast %2 : f32 to vector<2x2x2x7x7xf32>
    %112 = arith.mulf %111, %110 : vector<2x2x2x7x7xf32>
    %113 = arith.addf %106, %112 : vector<2x2x2x7x7xf32>
    %114 = vector.broadcast %11 : f32 to vector<2x2x2x7x7xf32>
    %115 = arith.mulf %114, %110 : vector<2x2x2x7x7xf32>
    %116 = arith.addf %109, %115 : vector<2x2x2x7x7xf32>
    %117 = vector.extract_strided_slice %97 {offsets = [1, 0, 0, 0, 0], sizes = [2, 2, 2, 7, 7], strides = [1, 1, 1, 1, 1]} : vector<4x4x2x7x7xf32> to vector<2x2x2x7x7xf32>
    %118 = vector.broadcast %3 : f32 to vector<2x2x2x7x7xf32>
    %119 = arith.mulf %118, %117 : vector<2x2x2x7x7xf32>
    %120 = arith.addf %113, %119 : vector<2x2x2x7x7xf32>
    %121 = vector.broadcast %12 : f32 to vector<2x2x2x7x7xf32>
    %122 = arith.mulf %121, %117 : vector<2x2x2x7x7xf32>
    %123 = arith.addf %116, %122 : vector<2x2x2x7x7xf32>
    %124 = vector.extract_strided_slice %97 {offsets = [1, 1, 0, 0, 0], sizes = [2, 2, 2, 7, 7], strides = [1, 1, 1, 1, 1]} : vector<4x4x2x7x7xf32> to vector<2x2x2x7x7xf32>
    %125 = vector.broadcast %4 : f32 to vector<2x2x2x7x7xf32>
    %126 = arith.mulf %125, %124 : vector<2x2x2x7x7xf32>
    %127 = arith.addf %120, %126 : vector<2x2x2x7x7xf32>
    %128 = vector.broadcast %13 : f32 to vector<2x2x2x7x7xf32>
    %129 = arith.mulf %128, %124 : vector<2x2x2x7x7xf32>
    %130 = arith.addf %123, %129 : vector<2x2x2x7x7xf32>
    %131 = vector.extract_strided_slice %97 {offsets = [1, 2, 0, 0, 0], sizes = [2, 2, 2, 7, 7], strides = [1, 1, 1, 1, 1]} : vector<4x4x2x7x7xf32> to vector<2x2x2x7x7xf32>
    %132 = vector.broadcast %5 : f32 to vector<2x2x2x7x7xf32>
    %133 = arith.mulf %132, %131 : vector<2x2x2x7x7xf32>
    %134 = arith.addf %127, %133 : vector<2x2x2x7x7xf32>
    %135 = vector.broadcast %14 : f32 to vector<2x2x2x7x7xf32>
    %136 = arith.mulf %135, %131 : vector<2x2x2x7x7xf32>
    %137 = arith.addf %130, %136 : vector<2x2x2x7x7xf32>
    %138 = vector.extract_strided_slice %97 {offsets = [2, 0, 0, 0, 0], sizes = [2, 2, 2, 7, 7], strides = [1, 1, 1, 1, 1]} : vector<4x4x2x7x7xf32> to vector<2x2x2x7x7xf32>
    %139 = vector.broadcast %6 : f32 to vector<2x2x2x7x7xf32>
    %140 = arith.mulf %139, %138 : vector<2x2x2x7x7xf32>
    %141 = arith.addf %134, %140 : vector<2x2x2x7x7xf32>
    %142 = vector.broadcast %15 : f32 to vector<2x2x2x7x7xf32>
    %143 = arith.mulf %142, %138 : vector<2x2x2x7x7xf32>
    %144 = arith.addf %137, %143 : vector<2x2x2x7x7xf32>
    %145 = vector.extract_strided_slice %97 {offsets = [2, 1, 0, 0, 0], sizes = [2, 2, 2, 7, 7], strides = [1, 1, 1, 1, 1]} : vector<4x4x2x7x7xf32> to vector<2x2x2x7x7xf32>
    %146 = vector.broadcast %7 : f32 to vector<2x2x2x7x7xf32>
    %147 = arith.mulf %146, %145 : vector<2x2x2x7x7xf32>
    %148 = arith.addf %141, %147 : vector<2x2x2x7x7xf32>
    %149 = vector.broadcast %16 : f32 to vector<2x2x2x7x7xf32>
    %150 = arith.mulf %149, %145 : vector<2x2x2x7x7xf32>
    %151 = arith.addf %144, %150 : vector<2x2x2x7x7xf32>
    %152 = vector.extract_strided_slice %97 {offsets = [2, 2, 0, 0, 0], sizes = [2, 2, 2, 7, 7], strides = [1, 1, 1, 1, 1]} : vector<4x4x2x7x7xf32> to vector<2x2x2x7x7xf32>
    %153 = vector.broadcast %8 : f32 to vector<2x2x2x7x7xf32>
    %154 = arith.mulf %153, %152 : vector<2x2x2x7x7xf32>
    %155 = arith.addf %148, %154 : vector<2x2x2x7x7xf32>
    %156 = vector.broadcast %17 : f32 to vector<2x2x2x7x7xf32>
    %157 = arith.mulf %156, %152 : vector<2x2x2x7x7xf32>
    %158 = arith.addf %151, %157 : vector<2x2x2x7x7xf32>
    %159 = vector.extract_strided_slice %155 {offsets = [0, 0, 0, 0, 0], sizes = [1, 1, 2, 7, 7], strides = [1, 1, 1, 1, 1]} : vector<2x2x2x7x7xf32> to vector<1x1x2x7x7xf32>
    %160 = vector.shape_cast %159 : vector<1x1x2x7x7xf32> to vector<2x7x7xf32>
    %161 = vector.extract_strided_slice %155 {offsets = [0, 1, 0, 0, 0], sizes = [1, 1, 2, 7, 7], strides = [1, 1, 1, 1, 1]} : vector<2x2x2x7x7xf32> to vector<1x1x2x7x7xf32>
    %162 = vector.shape_cast %161 : vector<1x1x2x7x7xf32> to vector<2x7x7xf32>
    %163 = arith.maximumf %160, %162 : vector<2x7x7xf32>
    %164 = vector.extract_strided_slice %155 {offsets = [1, 0, 0, 0, 0], sizes = [1, 1, 2, 7, 7], strides = [1, 1, 1, 1, 1]} : vector<2x2x2x7x7xf32> to vector<1x1x2x7x7xf32>
    %165 = vector.shape_cast %164 : vector<1x1x2x7x7xf32> to vector<2x7x7xf32>
    %166 = vector.extract_strided_slice %155 {offsets = [1, 1, 0, 0, 0], sizes = [1, 1, 2, 7, 7], strides = [1, 1, 1, 1, 1]} : vector<2x2x2x7x7xf32> to vector<1x1x2x7x7xf32>
    %167 = vector.shape_cast %166 : vector<1x1x2x7x7xf32> to vector<2x7x7xf32>
    %168 = arith.maximumf %165, %167 : vector<2x7x7xf32>
    %169 = arith.maximumf %163, %168 : vector<2x7x7xf32>
    %170 = vector.broadcast %18 : f32 to vector<2x7x7xf32>
    %171 = arith.addf %169, %170 : vector<2x7x7xf32>
    %cst = arith.constant 5.000000e-01 : f32
    %172 = vector.broadcast %cst : f32 to vector<2x7x7xf32>
    %173 = arith.mulf %172, %171 : vector<2x7x7xf32>
    %174 = math.tanh %173 : vector<2x7x7xf32>
    %cst_5 = arith.constant 1.000000e+00 : f32
    %175 = vector.broadcast %cst_5 : f32 to vector<2x7x7xf32>
    %176 = arith.addf %174, %175 : vector<2x7x7xf32>
    %cst_6 = arith.constant 5.000000e-01 : f32
    %177 = vector.broadcast %cst_6 : f32 to vector<2x7x7xf32>
    %178 = arith.mulf %177, %176 : vector<2x7x7xf32>
    %179 = vector.extract_strided_slice %158 {offsets = [0, 0, 0, 0, 0], sizes = [1, 1, 2, 7, 7], strides = [1, 1, 1, 1, 1]} : vector<2x2x2x7x7xf32> to vector<1x1x2x7x7xf32>
    %180 = vector.shape_cast %179 : vector<1x1x2x7x7xf32> to vector<2x7x7xf32>
    %181 = vector.extract_strided_slice %158 {offsets = [0, 1, 0, 0, 0], sizes = [1, 1, 2, 7, 7], strides = [1, 1, 1, 1, 1]} : vector<2x2x2x7x7xf32> to vector<1x1x2x7x7xf32>
    %182 = vector.shape_cast %181 : vector<1x1x2x7x7xf32> to vector<2x7x7xf32>
    %183 = arith.maximumf %180, %182 : vector<2x7x7xf32>
    %184 = vector.extract_strided_slice %158 {offsets = [1, 0, 0, 0, 0], sizes = [1, 1, 2, 7, 7], strides = [1, 1, 1, 1, 1]} : vector<2x2x2x7x7xf32> to vector<1x1x2x7x7xf32>
    %185 = vector.shape_cast %184 : vector<1x1x2x7x7xf32> to vector<2x7x7xf32>
    %186 = vector.extract_strided_slice %158 {offsets = [1, 1, 0, 0, 0], sizes = [1, 1, 2, 7, 7], strides = [1, 1, 1, 1, 1]} : vector<2x2x2x7x7xf32> to vector<1x1x2x7x7xf32>
    %187 = vector.shape_cast %186 : vector<1x1x2x7x7xf32> to vector<2x7x7xf32>
    %188 = arith.maximumf %185, %187 : vector<2x7x7xf32>
    %189 = arith.maximumf %183, %188 : vector<2x7x7xf32>
    %190 = vector.broadcast %19 : f32 to vector<2x7x7xf32>
    %191 = arith.addf %189, %190 : vector<2x7x7xf32>
    %cst_7 = arith.constant 5.000000e-01 : f32
    %192 = vector.broadcast %cst_7 : f32 to vector<2x7x7xf32>
    %193 = arith.mulf %192, %191 : vector<2x7x7xf32>
    %194 = math.tanh %193 : vector<2x7x7xf32>
    %cst_8 = arith.constant 1.000000e+00 : f32
    %195 = vector.broadcast %cst_8 : f32 to vector<2x7x7xf32>
    %196 = arith.addf %194, %195 : vector<2x7x7xf32>
    %cst_9 = arith.constant 5.000000e-01 : f32
    %197 = vector.broadcast %cst_9 : f32 to vector<2x7x7xf32>
    %198 = arith.mulf %197, %196 : vector<2x7x7xf32>
    %199 = vector.extract_strided_slice %178 {offsets = [0, 0, 0], sizes = [2, 4, 4], strides = [1, 1, 1]} : vector<2x7x7xf32> to vector<2x4x4xf32>
    %200 = vector.broadcast %20 : f32 to vector<2x4x4xf32>
    %201 = arith.mulf %200, %199 : vector<2x4x4xf32>
    %202 = vector.broadcast %38 : f32 to vector<2x4x4xf32>
    %203 = arith.mulf %202, %199 : vector<2x4x4xf32>
    %204 = vector.broadcast %56 : f32 to vector<2x4x4xf32>
    %205 = arith.mulf %204, %199 : vector<2x4x4xf32>
    %206 = vector.broadcast %74 : f32 to vector<2x4x4xf32>
    %207 = arith.mulf %206, %199 : vector<2x4x4xf32>
    %208 = vector.extract_strided_slice %178 {offsets = [0, 0, 1], sizes = [2, 4, 4], strides = [1, 1, 1]} : vector<2x7x7xf32> to vector<2x4x4xf32>
    %209 = vector.broadcast %21 : f32 to vector<2x4x4xf32>
    %210 = arith.mulf %209, %208 : vector<2x4x4xf32>
    %211 = arith.addf %201, %210 : vector<2x4x4xf32>
    %212 = vector.broadcast %39 : f32 to vector<2x4x4xf32>
    %213 = arith.mulf %212, %208 : vector<2x4x4xf32>
    %214 = arith.addf %203, %213 : vector<2x4x4xf32>
    %215 = vector.broadcast %57 : f32 to vector<2x4x4xf32>
    %216 = arith.mulf %215, %208 : vector<2x4x4xf32>
    %217 = arith.addf %205, %216 : vector<2x4x4xf32>
    %218 = vector.broadcast %75 : f32 to vector<2x4x4xf32>
    %219 = arith.mulf %218, %208 : vector<2x4x4xf32>
    %220 = arith.addf %207, %219 : vector<2x4x4xf32>
    %221 = vector.extract_strided_slice %178 {offsets = [0, 0, 2], sizes = [2, 4, 4], strides = [1, 1, 1]} : vector<2x7x7xf32> to vector<2x4x4xf32>
    %222 = vector.broadcast %22 : f32 to vector<2x4x4xf32>
    %223 = arith.mulf %222, %221 : vector<2x4x4xf32>
    %224 = arith.addf %211, %223 : vector<2x4x4xf32>
    %225 = vector.broadcast %40 : f32 to vector<2x4x4xf32>
    %226 = arith.mulf %225, %221 : vector<2x4x4xf32>
    %227 = arith.addf %214, %226 : vector<2x4x4xf32>
    %228 = vector.broadcast %58 : f32 to vector<2x4x4xf32>
    %229 = arith.mulf %228, %221 : vector<2x4x4xf32>
    %230 = arith.addf %217, %229 : vector<2x4x4xf32>
    %231 = vector.broadcast %76 : f32 to vector<2x4x4xf32>
    %232 = arith.mulf %231, %221 : vector<2x4x4xf32>
    %233 = arith.addf %220, %232 : vector<2x4x4xf32>
    %234 = vector.extract_strided_slice %178 {offsets = [0, 1, 0], sizes = [2, 4, 4], strides = [1, 1, 1]} : vector<2x7x7xf32> to vector<2x4x4xf32>
    %235 = vector.broadcast %23 : f32 to vector<2x4x4xf32>
    %236 = arith.mulf %235, %234 : vector<2x4x4xf32>
    %237 = arith.addf %224, %236 : vector<2x4x4xf32>
    %238 = vector.broadcast %41 : f32 to vector<2x4x4xf32>
    %239 = arith.mulf %238, %234 : vector<2x4x4xf32>
    %240 = arith.addf %227, %239 : vector<2x4x4xf32>
    %241 = vector.broadcast %59 : f32 to vector<2x4x4xf32>
    %242 = arith.mulf %241, %234 : vector<2x4x4xf32>
    %243 = arith.addf %230, %242 : vector<2x4x4xf32>
    %244 = vector.broadcast %77 : f32 to vector<2x4x4xf32>
    %245 = arith.mulf %244, %234 : vector<2x4x4xf32>
    %246 = arith.addf %233, %245 : vector<2x4x4xf32>
    %247 = vector.extract_strided_slice %178 {offsets = [0, 1, 1], sizes = [2, 4, 4], strides = [1, 1, 1]} : vector<2x7x7xf32> to vector<2x4x4xf32>
    %248 = vector.broadcast %24 : f32 to vector<2x4x4xf32>
    %249 = arith.mulf %248, %247 : vector<2x4x4xf32>
    %250 = arith.addf %237, %249 : vector<2x4x4xf32>
    %251 = vector.broadcast %42 : f32 to vector<2x4x4xf32>
    %252 = arith.mulf %251, %247 : vector<2x4x4xf32>
    %253 = arith.addf %240, %252 : vector<2x4x4xf32>
    %254 = vector.broadcast %60 : f32 to vector<2x4x4xf32>
    %255 = arith.mulf %254, %247 : vector<2x4x4xf32>
    %256 = arith.addf %243, %255 : vector<2x4x4xf32>
    %257 = vector.broadcast %78 : f32 to vector<2x4x4xf32>
    %258 = arith.mulf %257, %247 : vector<2x4x4xf32>
    %259 = arith.addf %246, %258 : vector<2x4x4xf32>
    %260 = vector.extract_strided_slice %178 {offsets = [0, 1, 2], sizes = [2, 4, 4], strides = [1, 1, 1]} : vector<2x7x7xf32> to vector<2x4x4xf32>
    %261 = vector.broadcast %25 : f32 to vector<2x4x4xf32>
    %262 = arith.mulf %261, %260 : vector<2x4x4xf32>
    %263 = arith.addf %250, %262 : vector<2x4x4xf32>
    %264 = vector.broadcast %43 : f32 to vector<2x4x4xf32>
    %265 = arith.mulf %264, %260 : vector<2x4x4xf32>
    %266 = arith.addf %253, %265 : vector<2x4x4xf32>
    %267 = vector.broadcast %61 : f32 to vector<2x4x4xf32>
    %268 = arith.mulf %267, %260 : vector<2x4x4xf32>
    %269 = arith.addf %256, %268 : vector<2x4x4xf32>
    %270 = vector.broadcast %79 : f32 to vector<2x4x4xf32>
    %271 = arith.mulf %270, %260 : vector<2x4x4xf32>
    %272 = arith.addf %259, %271 : vector<2x4x4xf32>
    %273 = vector.extract_strided_slice %178 {offsets = [0, 2, 0], sizes = [2, 4, 4], strides = [1, 1, 1]} : vector<2x7x7xf32> to vector<2x4x4xf32>
    %274 = vector.broadcast %26 : f32 to vector<2x4x4xf32>
    %275 = arith.mulf %274, %273 : vector<2x4x4xf32>
    %276 = arith.addf %263, %275 : vector<2x4x4xf32>
    %277 = vector.broadcast %44 : f32 to vector<2x4x4xf32>
    %278 = arith.mulf %277, %273 : vector<2x4x4xf32>
    %279 = arith.addf %266, %278 : vector<2x4x4xf32>
    %280 = vector.broadcast %62 : f32 to vector<2x4x4xf32>
    %281 = arith.mulf %280, %273 : vector<2x4x4xf32>
    %282 = arith.addf %269, %281 : vector<2x4x4xf32>
    %283 = vector.broadcast %80 : f32 to vector<2x4x4xf32>
    %284 = arith.mulf %283, %273 : vector<2x4x4xf32>
    %285 = arith.addf %272, %284 : vector<2x4x4xf32>
    %286 = vector.extract_strided_slice %178 {offsets = [0, 2, 1], sizes = [2, 4, 4], strides = [1, 1, 1]} : vector<2x7x7xf32> to vector<2x4x4xf32>
    %287 = vector.broadcast %27 : f32 to vector<2x4x4xf32>
    %288 = arith.mulf %287, %286 : vector<2x4x4xf32>
    %289 = arith.addf %276, %288 : vector<2x4x4xf32>
    %290 = vector.broadcast %45 : f32 to vector<2x4x4xf32>
    %291 = arith.mulf %290, %286 : vector<2x4x4xf32>
    %292 = arith.addf %279, %291 : vector<2x4x4xf32>
    %293 = vector.broadcast %63 : f32 to vector<2x4x4xf32>
    %294 = arith.mulf %293, %286 : vector<2x4x4xf32>
    %295 = arith.addf %282, %294 : vector<2x4x4xf32>
    %296 = vector.broadcast %81 : f32 to vector<2x4x4xf32>
    %297 = arith.mulf %296, %286 : vector<2x4x4xf32>
    %298 = arith.addf %285, %297 : vector<2x4x4xf32>
    %299 = vector.extract_strided_slice %178 {offsets = [0, 2, 2], sizes = [2, 4, 4], strides = [1, 1, 1]} : vector<2x7x7xf32> to vector<2x4x4xf32>
    %300 = vector.broadcast %28 : f32 to vector<2x4x4xf32>
    %301 = arith.mulf %300, %299 : vector<2x4x4xf32>
    %302 = arith.addf %289, %301 : vector<2x4x4xf32>
    %303 = vector.broadcast %46 : f32 to vector<2x4x4xf32>
    %304 = arith.mulf %303, %299 : vector<2x4x4xf32>
    %305 = arith.addf %292, %304 : vector<2x4x4xf32>
    %306 = vector.broadcast %64 : f32 to vector<2x4x4xf32>
    %307 = arith.mulf %306, %299 : vector<2x4x4xf32>
    %308 = arith.addf %295, %307 : vector<2x4x4xf32>
    %309 = vector.broadcast %82 : f32 to vector<2x4x4xf32>
    %310 = arith.mulf %309, %299 : vector<2x4x4xf32>
    %311 = arith.addf %298, %310 : vector<2x4x4xf32>
    %312 = vector.extract_strided_slice %198 {offsets = [0, 0, 0], sizes = [2, 4, 4], strides = [1, 1, 1]} : vector<2x7x7xf32> to vector<2x4x4xf32>
    %313 = vector.broadcast %29 : f32 to vector<2x4x4xf32>
    %314 = arith.mulf %313, %312 : vector<2x4x4xf32>
    %315 = arith.addf %302, %314 : vector<2x4x4xf32>
    %316 = vector.broadcast %47 : f32 to vector<2x4x4xf32>
    %317 = arith.mulf %316, %312 : vector<2x4x4xf32>
    %318 = arith.addf %305, %317 : vector<2x4x4xf32>
    %319 = vector.broadcast %65 : f32 to vector<2x4x4xf32>
    %320 = arith.mulf %319, %312 : vector<2x4x4xf32>
    %321 = arith.addf %308, %320 : vector<2x4x4xf32>
    %322 = vector.broadcast %83 : f32 to vector<2x4x4xf32>
    %323 = arith.mulf %322, %312 : vector<2x4x4xf32>
    %324 = arith.addf %311, %323 : vector<2x4x4xf32>
    %325 = vector.extract_strided_slice %198 {offsets = [0, 0, 1], sizes = [2, 4, 4], strides = [1, 1, 1]} : vector<2x7x7xf32> to vector<2x4x4xf32>
    %326 = vector.broadcast %30 : f32 to vector<2x4x4xf32>
    %327 = arith.mulf %326, %325 : vector<2x4x4xf32>
    %328 = arith.addf %315, %327 : vector<2x4x4xf32>
    %329 = vector.broadcast %48 : f32 to vector<2x4x4xf32>
    %330 = arith.mulf %329, %325 : vector<2x4x4xf32>
    %331 = arith.addf %318, %330 : vector<2x4x4xf32>
    %332 = vector.broadcast %66 : f32 to vector<2x4x4xf32>
    %333 = arith.mulf %332, %325 : vector<2x4x4xf32>
    %334 = arith.addf %321, %333 : vector<2x4x4xf32>
    %335 = vector.broadcast %84 : f32 to vector<2x4x4xf32>
    %336 = arith.mulf %335, %325 : vector<2x4x4xf32>
    %337 = arith.addf %324, %336 : vector<2x4x4xf32>
    %338 = vector.extract_strided_slice %198 {offsets = [0, 0, 2], sizes = [2, 4, 4], strides = [1, 1, 1]} : vector<2x7x7xf32> to vector<2x4x4xf32>
    %339 = vector.broadcast %31 : f32 to vector<2x4x4xf32>
    %340 = arith.mulf %339, %338 : vector<2x4x4xf32>
    %341 = arith.addf %328, %340 : vector<2x4x4xf32>
    %342 = vector.broadcast %49 : f32 to vector<2x4x4xf32>
    %343 = arith.mulf %342, %338 : vector<2x4x4xf32>
    %344 = arith.addf %331, %343 : vector<2x4x4xf32>
    %345 = vector.broadcast %67 : f32 to vector<2x4x4xf32>
    %346 = arith.mulf %345, %338 : vector<2x4x4xf32>
    %347 = arith.addf %334, %346 : vector<2x4x4xf32>
    %348 = vector.broadcast %85 : f32 to vector<2x4x4xf32>
    %349 = arith.mulf %348, %338 : vector<2x4x4xf32>
    %350 = arith.addf %337, %349 : vector<2x4x4xf32>
    %351 = vector.extract_strided_slice %198 {offsets = [0, 1, 0], sizes = [2, 4, 4], strides = [1, 1, 1]} : vector<2x7x7xf32> to vector<2x4x4xf32>
    %352 = vector.broadcast %32 : f32 to vector<2x4x4xf32>
    %353 = arith.mulf %352, %351 : vector<2x4x4xf32>
    %354 = arith.addf %341, %353 : vector<2x4x4xf32>
    %355 = vector.broadcast %50 : f32 to vector<2x4x4xf32>
    %356 = arith.mulf %355, %351 : vector<2x4x4xf32>
    %357 = arith.addf %344, %356 : vector<2x4x4xf32>
    %358 = vector.broadcast %68 : f32 to vector<2x4x4xf32>
    %359 = arith.mulf %358, %351 : vector<2x4x4xf32>
    %360 = arith.addf %347, %359 : vector<2x4x4xf32>
    %361 = vector.broadcast %86 : f32 to vector<2x4x4xf32>
    %362 = arith.mulf %361, %351 : vector<2x4x4xf32>
    %363 = arith.addf %350, %362 : vector<2x4x4xf32>
    %364 = vector.extract_strided_slice %198 {offsets = [0, 1, 1], sizes = [2, 4, 4], strides = [1, 1, 1]} : vector<2x7x7xf32> to vector<2x4x4xf32>
    %365 = vector.broadcast %33 : f32 to vector<2x4x4xf32>
    %366 = arith.mulf %365, %364 : vector<2x4x4xf32>
    %367 = arith.addf %354, %366 : vector<2x4x4xf32>
    %368 = vector.broadcast %51 : f32 to vector<2x4x4xf32>
    %369 = arith.mulf %368, %364 : vector<2x4x4xf32>
    %370 = arith.addf %357, %369 : vector<2x4x4xf32>
    %371 = vector.broadcast %69 : f32 to vector<2x4x4xf32>
    %372 = arith.mulf %371, %364 : vector<2x4x4xf32>
    %373 = arith.addf %360, %372 : vector<2x4x4xf32>
    %374 = vector.broadcast %87 : f32 to vector<2x4x4xf32>
    %375 = arith.mulf %374, %364 : vector<2x4x4xf32>
    %376 = arith.addf %363, %375 : vector<2x4x4xf32>
    %377 = vector.extract_strided_slice %198 {offsets = [0, 1, 2], sizes = [2, 4, 4], strides = [1, 1, 1]} : vector<2x7x7xf32> to vector<2x4x4xf32>
    %378 = vector.broadcast %34 : f32 to vector<2x4x4xf32>
    %379 = arith.mulf %378, %377 : vector<2x4x4xf32>
    %380 = arith.addf %367, %379 : vector<2x4x4xf32>
    %381 = vector.broadcast %52 : f32 to vector<2x4x4xf32>
    %382 = arith.mulf %381, %377 : vector<2x4x4xf32>
    %383 = arith.addf %370, %382 : vector<2x4x4xf32>
    %384 = vector.broadcast %70 : f32 to vector<2x4x4xf32>
    %385 = arith.mulf %384, %377 : vector<2x4x4xf32>
    %386 = arith.addf %373, %385 : vector<2x4x4xf32>
    %387 = vector.broadcast %88 : f32 to vector<2x4x4xf32>
    %388 = arith.mulf %387, %377 : vector<2x4x4xf32>
    %389 = arith.addf %376, %388 : vector<2x4x4xf32>
    %390 = vector.extract_strided_slice %198 {offsets = [0, 2, 0], sizes = [2, 4, 4], strides = [1, 1, 1]} : vector<2x7x7xf32> to vector<2x4x4xf32>
    %391 = vector.broadcast %35 : f32 to vector<2x4x4xf32>
    %392 = arith.mulf %391, %390 : vector<2x4x4xf32>
    %393 = arith.addf %380, %392 : vector<2x4x4xf32>
    %394 = vector.broadcast %53 : f32 to vector<2x4x4xf32>
    %395 = arith.mulf %394, %390 : vector<2x4x4xf32>
    %396 = arith.addf %383, %395 : vector<2x4x4xf32>
    %397 = vector.broadcast %71 : f32 to vector<2x4x4xf32>
    %398 = arith.mulf %397, %390 : vector<2x4x4xf32>
    %399 = arith.addf %386, %398 : vector<2x4x4xf32>
    %400 = vector.broadcast %89 : f32 to vector<2x4x4xf32>
    %401 = arith.mulf %400, %390 : vector<2x4x4xf32>
    %402 = arith.addf %389, %401 : vector<2x4x4xf32>
    %403 = vector.extract_strided_slice %198 {offsets = [0, 2, 1], sizes = [2, 4, 4], strides = [1, 1, 1]} : vector<2x7x7xf32> to vector<2x4x4xf32>
    %404 = vector.broadcast %36 : f32 to vector<2x4x4xf32>
    %405 = arith.mulf %404, %403 : vector<2x4x4xf32>
    %406 = arith.addf %393, %405 : vector<2x4x4xf32>
    %407 = vector.broadcast %54 : f32 to vector<2x4x4xf32>
    %408 = arith.mulf %407, %403 : vector<2x4x4xf32>
    %409 = arith.addf %396, %408 : vector<2x4x4xf32>
    %410 = vector.broadcast %72 : f32 to vector<2x4x4xf32>
    %411 = arith.mulf %410, %403 : vector<2x4x4xf32>
    %412 = arith.addf %399, %411 : vector<2x4x4xf32>
    %413 = vector.broadcast %90 : f32 to vector<2x4x4xf32>
    %414 = arith.mulf %413, %403 : vector<2x4x4xf32>
    %415 = arith.addf %402, %414 : vector<2x4x4xf32>
    %416 = vector.extract_strided_slice %198 {offsets = [0, 2, 2], sizes = [2, 4, 4], strides = [1, 1, 1]} : vector<2x7x7xf32> to vector<2x4x4xf32>
    %417 = vector.broadcast %37 : f32 to vector<2x4x4xf32>
    %418 = arith.mulf %417, %416 : vector<2x4x4xf32>
    %419 = arith.addf %406, %418 : vector<2x4x4xf32>
    %420 = vector.broadcast %55 : f32 to vector<2x4x4xf32>
    %421 = arith.mulf %420, %416 : vector<2x4x4xf32>
    %422 = arith.addf %409, %421 : vector<2x4x4xf32>
    %423 = vector.broadcast %73 : f32 to vector<2x4x4xf32>
    %424 = arith.mulf %423, %416 : vector<2x4x4xf32>
    %425 = arith.addf %412, %424 : vector<2x4x4xf32>
    %426 = vector.broadcast %91 : f32 to vector<2x4x4xf32>
    %427 = arith.mulf %426, %416 : vector<2x4x4xf32>
    %428 = arith.addf %415, %427 : vector<2x4x4xf32>
    %429 = vector.broadcast %92 : f32 to vector<2x4x4xf32>
    %430 = arith.addf %419, %429 : vector<2x4x4xf32>
    %431 = vector.extract_strided_slice %430 {offsets = [0, 0, 0], sizes = [2, 1, 4], strides = [1, 1, 1]} : vector<2x4x4xf32> to vector<2x1x4xf32>
    %432 = vector.extract_strided_slice %430 {offsets = [0, 1, 0], sizes = [2, 1, 4], strides = [1, 1, 1]} : vector<2x4x4xf32> to vector<2x1x4xf32>
    %433 = arith.maximumf %431, %432 : vector<2x1x4xf32>
    %434 = vector.extract_strided_slice %430 {offsets = [0, 2, 0], sizes = [2, 1, 4], strides = [1, 1, 1]} : vector<2x4x4xf32> to vector<2x1x4xf32>
    %435 = vector.extract_strided_slice %430 {offsets = [0, 3, 0], sizes = [2, 1, 4], strides = [1, 1, 1]} : vector<2x4x4xf32> to vector<2x1x4xf32>
    %436 = arith.maximumf %434, %435 : vector<2x1x4xf32>
    %437 = vector.extract_strided_slice %433 {offsets = [0, 0, 0], sizes = [2, 1, 1], strides = [1, 1, 1]} : vector<2x1x4xf32> to vector<2x1x1xf32>
    %438 = vector.extract_strided_slice %433 {offsets = [0, 0, 1], sizes = [2, 1, 1], strides = [1, 1, 1]} : vector<2x1x4xf32> to vector<2x1x1xf32>
    %439 = arith.maximumf %437, %438 : vector<2x1x1xf32>
    %440 = vector.extract_strided_slice %433 {offsets = [0, 0, 2], sizes = [2, 1, 1], strides = [1, 1, 1]} : vector<2x1x4xf32> to vector<2x1x1xf32>
    %441 = vector.extract_strided_slice %433 {offsets = [0, 0, 3], sizes = [2, 1, 1], strides = [1, 1, 1]} : vector<2x1x4xf32> to vector<2x1x1xf32>
    %442 = arith.maximumf %440, %441 : vector<2x1x1xf32>
    %443 = vector.extract_strided_slice %436 {offsets = [0, 0, 0], sizes = [2, 1, 1], strides = [1, 1, 1]} : vector<2x1x4xf32> to vector<2x1x1xf32>
    %444 = vector.extract_strided_slice %436 {offsets = [0, 0, 1], sizes = [2, 1, 1], strides = [1, 1, 1]} : vector<2x1x4xf32> to vector<2x1x1xf32>
    %445 = arith.maximumf %443, %444 : vector<2x1x1xf32>
    %446 = vector.extract_strided_slice %436 {offsets = [0, 0, 2], sizes = [2, 1, 1], strides = [1, 1, 1]} : vector<2x1x4xf32> to vector<2x1x1xf32>
    %447 = vector.extract_strided_slice %436 {offsets = [0, 0, 3], sizes = [2, 1, 1], strides = [1, 1, 1]} : vector<2x1x4xf32> to vector<2x1x1xf32>
    %448 = arith.maximumf %446, %447 : vector<2x1x1xf32>
    %449 = vector.broadcast %93 : f32 to vector<2x4x4xf32>
    %450 = arith.addf %422, %449 : vector<2x4x4xf32>
    %451 = vector.extract_strided_slice %450 {offsets = [0, 0, 0], sizes = [2, 1, 4], strides = [1, 1, 1]} : vector<2x4x4xf32> to vector<2x1x4xf32>
    %452 = vector.extract_strided_slice %450 {offsets = [0, 1, 0], sizes = [2, 1, 4], strides = [1, 1, 1]} : vector<2x4x4xf32> to vector<2x1x4xf32>
    %453 = arith.maximumf %451, %452 : vector<2x1x4xf32>
    %454 = vector.extract_strided_slice %450 {offsets = [0, 2, 0], sizes = [2, 1, 4], strides = [1, 1, 1]} : vector<2x4x4xf32> to vector<2x1x4xf32>
    %455 = vector.extract_strided_slice %450 {offsets = [0, 3, 0], sizes = [2, 1, 4], strides = [1, 1, 1]} : vector<2x4x4xf32> to vector<2x1x4xf32>
    %456 = arith.maximumf %454, %455 : vector<2x1x4xf32>
    %457 = vector.extract_strided_slice %453 {offsets = [0, 0, 0], sizes = [2, 1, 1], strides = [1, 1, 1]} : vector<2x1x4xf32> to vector<2x1x1xf32>
    %458 = vector.extract_strided_slice %453 {offsets = [0, 0, 1], sizes = [2, 1, 1], strides = [1, 1, 1]} : vector<2x1x4xf32> to vector<2x1x1xf32>
    %459 = arith.maximumf %457, %458 : vector<2x1x1xf32>
    %460 = vector.extract_strided_slice %453 {offsets = [0, 0, 2], sizes = [2, 1, 1], strides = [1, 1, 1]} : vector<2x1x4xf32> to vector<2x1x1xf32>
    %461 = vector.extract_strided_slice %453 {offsets = [0, 0, 3], sizes = [2, 1, 1], strides = [1, 1, 1]} : vector<2x1x4xf32> to vector<2x1x1xf32>
    %462 = arith.maximumf %460, %461 : vector<2x1x1xf32>
    %463 = vector.extract_strided_slice %456 {offsets = [0, 0, 0], sizes = [2, 1, 1], strides = [1, 1, 1]} : vector<2x1x4xf32> to vector<2x1x1xf32>
    %464 = vector.extract_strided_slice %456 {offsets = [0, 0, 1], sizes = [2, 1, 1], strides = [1, 1, 1]} : vector<2x1x4xf32> to vector<2x1x1xf32>
    %465 = arith.maximumf %463, %464 : vector<2x1x1xf32>
    %466 = vector.extract_strided_slice %456 {offsets = [0, 0, 2], sizes = [2, 1, 1], strides = [1, 1, 1]} : vector<2x1x4xf32> to vector<2x1x1xf32>
    %467 = vector.extract_strided_slice %456 {offsets = [0, 0, 3], sizes = [2, 1, 1], strides = [1, 1, 1]} : vector<2x1x4xf32> to vector<2x1x1xf32>
    %468 = arith.maximumf %466, %467 : vector<2x1x1xf32>
    %469 = vector.broadcast %94 : f32 to vector<2x4x4xf32>
    %470 = arith.addf %425, %469 : vector<2x4x4xf32>
    %471 = vector.extract_strided_slice %470 {offsets = [0, 0, 0], sizes = [2, 1, 4], strides = [1, 1, 1]} : vector<2x4x4xf32> to vector<2x1x4xf32>
    %472 = vector.extract_strided_slice %470 {offsets = [0, 1, 0], sizes = [2, 1, 4], strides = [1, 1, 1]} : vector<2x4x4xf32> to vector<2x1x4xf32>
    %473 = arith.maximumf %471, %472 : vector<2x1x4xf32>
    %474 = vector.extract_strided_slice %470 {offsets = [0, 2, 0], sizes = [2, 1, 4], strides = [1, 1, 1]} : vector<2x4x4xf32> to vector<2x1x4xf32>
    %475 = vector.extract_strided_slice %470 {offsets = [0, 3, 0], sizes = [2, 1, 4], strides = [1, 1, 1]} : vector<2x4x4xf32> to vector<2x1x4xf32>
    %476 = arith.maximumf %474, %475 : vector<2x1x4xf32>
    %477 = vector.extract_strided_slice %473 {offsets = [0, 0, 0], sizes = [2, 1, 1], strides = [1, 1, 1]} : vector<2x1x4xf32> to vector<2x1x1xf32>
    %478 = vector.extract_strided_slice %473 {offsets = [0, 0, 1], sizes = [2, 1, 1], strides = [1, 1, 1]} : vector<2x1x4xf32> to vector<2x1x1xf32>
    %479 = arith.maximumf %477, %478 : vector<2x1x1xf32>
    %480 = vector.extract_strided_slice %473 {offsets = [0, 0, 2], sizes = [2, 1, 1], strides = [1, 1, 1]} : vector<2x1x4xf32> to vector<2x1x1xf32>
    %481 = vector.extract_strided_slice %473 {offsets = [0, 0, 3], sizes = [2, 1, 1], strides = [1, 1, 1]} : vector<2x1x4xf32> to vector<2x1x1xf32>
    %482 = arith.maximumf %480, %481 : vector<2x1x1xf32>
    %483 = vector.extract_strided_slice %476 {offsets = [0, 0, 0], sizes = [2, 1, 1], strides = [1, 1, 1]} : vector<2x1x4xf32> to vector<2x1x1xf32>
    %484 = vector.extract_strided_slice %476 {offsets = [0, 0, 1], sizes = [2, 1, 1], strides = [1, 1, 1]} : vector<2x1x4xf32> to vector<2x1x1xf32>
    %485 = arith.maximumf %483, %484 : vector<2x1x1xf32>
    %486 = vector.extract_strided_slice %476 {offsets = [0, 0, 2], sizes = [2, 1, 1], strides = [1, 1, 1]} : vector<2x1x4xf32> to vector<2x1x1xf32>
    %487 = vector.extract_strided_slice %476 {offsets = [0, 0, 3], sizes = [2, 1, 1], strides = [1, 1, 1]} : vector<2x1x4xf32> to vector<2x1x1xf32>
    %488 = arith.maximumf %486, %487 : vector<2x1x1xf32>
    %489 = vector.broadcast %95 : f32 to vector<2x4x4xf32>
    %490 = arith.addf %428, %489 : vector<2x4x4xf32>
    %491 = vector.extract_strided_slice %490 {offsets = [0, 0, 0], sizes = [2, 1, 4], strides = [1, 1, 1]} : vector<2x4x4xf32> to vector<2x1x4xf32>
    %492 = vector.extract_strided_slice %490 {offsets = [0, 1, 0], sizes = [2, 1, 4], strides = [1, 1, 1]} : vector<2x4x4xf32> to vector<2x1x4xf32>
    %493 = arith.maximumf %491, %492 : vector<2x1x4xf32>
    %494 = vector.extract_strided_slice %490 {offsets = [0, 2, 0], sizes = [2, 1, 4], strides = [1, 1, 1]} : vector<2x4x4xf32> to vector<2x1x4xf32>
    %495 = vector.extract_strided_slice %490 {offsets = [0, 3, 0], sizes = [2, 1, 4], strides = [1, 1, 1]} : vector<2x4x4xf32> to vector<2x1x4xf32>
    %496 = arith.maximumf %494, %495 : vector<2x1x4xf32>
    %497 = vector.extract_strided_slice %493 {offsets = [0, 0, 0], sizes = [2, 1, 1], strides = [1, 1, 1]} : vector<2x1x4xf32> to vector<2x1x1xf32>
    %498 = vector.extract_strided_slice %493 {offsets = [0, 0, 1], sizes = [2, 1, 1], strides = [1, 1, 1]} : vector<2x1x4xf32> to vector<2x1x1xf32>
    %499 = arith.maximumf %497, %498 : vector<2x1x1xf32>
    %500 = vector.extract_strided_slice %493 {offsets = [0, 0, 2], sizes = [2, 1, 1], strides = [1, 1, 1]} : vector<2x1x4xf32> to vector<2x1x1xf32>
    %501 = vector.extract_strided_slice %493 {offsets = [0, 0, 3], sizes = [2, 1, 1], strides = [1, 1, 1]} : vector<2x1x4xf32> to vector<2x1x1xf32>
    %502 = arith.maximumf %500, %501 : vector<2x1x1xf32>
    %503 = vector.extract_strided_slice %496 {offsets = [0, 0, 0], sizes = [2, 1, 1], strides = [1, 1, 1]} : vector<2x1x4xf32> to vector<2x1x1xf32>
    %504 = vector.extract_strided_slice %496 {offsets = [0, 0, 1], sizes = [2, 1, 1], strides = [1, 1, 1]} : vector<2x1x4xf32> to vector<2x1x1xf32>
    %505 = arith.maximumf %503, %504 : vector<2x1x1xf32>
    %506 = vector.extract_strided_slice %496 {offsets = [0, 0, 2], sizes = [2, 1, 1], strides = [1, 1, 1]} : vector<2x1x4xf32> to vector<2x1x1xf32>
    %507 = vector.extract_strided_slice %496 {offsets = [0, 0, 3], sizes = [2, 1, 1], strides = [1, 1, 1]} : vector<2x1x4xf32> to vector<2x1x1xf32>
    %508 = arith.maximumf %506, %507 : vector<2x1x1xf32>
    %509 = tpu.concatenate %439, %442, %445, %448, %459, %462, %465, %468, %479, %482, %485, %488, %499, %502, %505, %508 in 1 : vector<2x1x1xf32>, vector<2x1x1xf32>, vector<2x1x1xf32>, vector<2x1x1xf32>, vector<2x1x1xf32>, vector<2x1x1xf32>, vector<2x1x1xf32>, vector<2x1x1xf32>, vector<2x1x1xf32>, vector<2x1x1xf32>, vector<2x1x1xf32>, vector<2x1x1xf32>, vector<2x1x1xf32>, vector<2x1x1xf32>, vector<2x1x1xf32>, vector<2x1x1xf32> -> vector<2x16x1xf32>
    %cst_10 = arith.constant 5.000000e-01 : f32
    %510 = vector.broadcast %cst_10 : f32 to vector<2x16x1xf32>
    %511 = arith.mulf %510, %509 : vector<2x16x1xf32>
    %512 = math.tanh %511 : vector<2x16x1xf32>
    %cst_11 = arith.constant 1.000000e+00 : f32
    %513 = vector.broadcast %cst_11 : f32 to vector<2x16x1xf32>
    %514 = arith.addf %512, %513 : vector<2x16x1xf32>
    %cst_12 = arith.constant 5.000000e-01 : f32
    %515 = vector.broadcast %cst_12 : f32 to vector<2x16x1xf32>
    %516 = arith.mulf %515, %514 : vector<2x16x1xf32>
    %c0_13 = arith.constant 0 : index
    %c0_14 = arith.constant 0 : index
    %517 = vector.load %arg2[%c0_13, %c0_14] : memref<18x4xf32, #tpu.memory_space<vmem>>, vector<18x4xf32>
    %518 = vector.extract_strided_slice %517 {offsets = [0, 0], sizes = [16, 4], strides = [1, 1]} : vector<18x4xf32> to vector<16x4xf32>
    %519 = vector.extract_strided_slice %517 {offsets = [16, 0], sizes = [1, 4], strides = [1, 1]} : vector<18x4xf32> to vector<1x4xf32>
    %520 = vector.extract_strided_slice %517 {offsets = [17, 0], sizes = [1, 4], strides = [1, 1]} : vector<18x4xf32> to vector<1x4xf32>
    %521 = vector.shape_cast %518 : vector<16x4xf32> to vector<1x16x4xf32>
    %522 = vector.broadcast %516 : vector<2x16x1xf32> to vector<2x16x4xf32>
    %523 = vector.broadcast %521 : vector<1x16x4xf32> to vector<2x16x4xf32>
    %524 = arith.mulf %522, %523 : vector<2x16x4xf32>
    %cst_15 = arith.constant dense<0.000000e+00> : vector<2x4xf32>
    %525 = vector.multi_reduction <add>, %524, %cst_15 [1] : vector<2x16x4xf32> to vector<2x4xf32>
    %526 = vector.broadcast %519 : vector<1x4xf32> to vector<2x4xf32>
    %527 = arith.addf %525, %526 : vector<2x4xf32>
    %cst_16 = arith.constant 0.000000e+00 : f32
    %528 = vector.broadcast %cst_16 : f32 to vector<2x4xf32>
    %529 = arith.maximumf %527, %528 : vector<2x4xf32>
    %530 = vector.broadcast %520 : vector<1x4xf32> to vector<2x4xf32>
    %531 = arith.mulf %529, %530 : vector<2x4xf32>
    %cst_17 = arith.constant dense<0.000000e+00> : vector<2xf32>
    %532 = vector.multi_reduction <add>, %531, %cst_17 [1] : vector<2x4xf32> to vector<2xf32>
    %533 = vector.shape_cast %532 : vector<2xf32> to vector<2x1xf32>
    %534 = vector.broadcast %96 : f32 to vector<2x1xf32>
    %535 = arith.addf %533, %534 : vector<2x1xf32>
    %cst_18 = arith.constant 0.000000e+00 : f32
    %536 = vector.broadcast %cst_18 : f32 to vector<2x1xf32>
    %537 = arith.maximumf %535, %536 : vector<2x1xf32>
    %c0_19 = arith.constant 0 : index
    %c0_20 = arith.constant 0 : index
    %538 = vector.load %arg3[%c0_19, %c0_20] : memref<2x1xf32, #tpu.memory_space<vmem>>, vector<2x1xf32>
    tpu.vector_store %arg3[%c0_19, %c0_20], %537 {strides = array<i32>} : memref<2x1xf32, #tpu.memory_space<vmem>>, vector<2x1xf32>,
    return
  }
}

</mosaic_0001>

<bundles_post_ra>
// kernel: noconvblock_forward.1
= control target key start
LH: loop header
LB: loop body
LE: loop exit
PB: predicated region body
PF: predicated region fallthrough
CT: control target
= control target key end

     0   :  { %8 = vsyncpa [#allocation3], 0  ;;  %s1766_s15 = smov [#allocation2]   ;;  %s2908_s0 = inlined_call_operand.vmem [shape: f32[4,4,2,7,7], index: 0, kind: input, shape index: {}]   ;;  %s2909_s1 = inlined_call_operand.vmem [shape: f32[97], index: 1, kind: input, shape index: {}]   ;;  %s2910_s2 = inlined_call_operand.vmem [shape: f32[18,4], index: 2, kind: input, shape index: {}]   ;;  %s2911_s3 = inlined_call_operand.vmem [shape: f32[2,1], index: 3, kind: output, shape index: {}]  }
   0x1   :  { %s16_s14 = sshll.u32 %s2909_s1, 4  ;;  %s17_s14 = int_to_ptr.vmem [resolvable:$true] %s16_s14 }
   0x2   :  { %19 = dma.vmem_to_smem %s17_s14, 16, %s1766_s15, [#allocation3]  }
   0x3   :  { %1764 = dma.done.wait [#allocation3], 16  }
   0x4   :  { %1765 = vsyncadd [#allocation3], 4294967280 }
   0x5   :  { %26 = sfence }
   0x6   :  { %s27_s16 = sld [smem:[#allocation2]]  ;;  %v1796_v0 = vld [vmem:[%s2908_s0] sm:$0x7f]  ;;  %v1801_v1 = vld [vmem:[%s2908_s0 + $0x8] sm:$0x7f]  ;;  %s1767_s8 = smov 127  }
   0x7   :  { %s1633_s17 = sld [smem:[#allocation2 + $0x1]]  ;;  %v1806_v2 = vld [vmem:[%s2908_s0 + $0x10] sm:$0x7f]  ;;  %v1811_v3 = vld [vmem:[%s2908_s0 + $0x18] sm:$0x7f]  ;;  %s1768_s12 = smov 126  }
   0x8   :  { %s1634_s18 = sld [smem:[#allocation2 + $0x2]]  ;;  %v1816_v4 = vld [vmem:[%s2908_s0 + $0x40] sm:$0x7f]  ;;  %v1821_v5 = vld [vmem:[%s2908_s0 + $0x48] sm:$0x7f]  ;;  %vm1508_vm0 = vcmask 1040384  }
   0x9   :  { %v1826_v6 = vld [vmem:[%s2908_s0 + $0x50] sm:$0x7f]  ;;  %v1831_v7 = vld [vmem:[%s2908_s0 + $0x58] sm:$0x7f]  ;;  %v1836_v9 = vld [vmem:[%s2908_s0 + $0x20] sm:$0x7f] }
   0xa   :  { %v1841_v10 = vld [vmem:[%s2908_s0 + $0x28] sm:$0x7f]  ;;  %v1848_v13 = vld [vmem:[%s2908_s0 + $0x60] sm:$0x7f]  ;;  %s1861_s15 = sld [smem:[#allocation2 + $0x3]]  ;;  %vm1511_vm1 = vcmask 1041408  }
   0xb   :  { %v1853_v14 = vld [vmem:[%s2908_s0 + $0x68] sm:$0x7f]  ;;  %v1870_v27 = vld [vmem:[%s2908_s0 + $0x30] sm:$0x7f]  ;;  %v1875_v28 = vld [vmem:[%s2908_s0 + $0x38] sm:$0x7f] }
   0xc   :  { %v156_v8 = vstv %s27_s16  ;;  %v1884_v33 = vld [vmem:[%s2908_s0 + $0x70] sm:$0x7f]  ;;  %v1889_v37 = vld [vmem:[%s2908_s0 + $0x78] sm:$0x7f]  ;;  %s1895_s23 = sld [smem:[#allocation2 + $0x4]]  ;;  %vm1514_vm2 = vcmask 1042432  }
   0xd   :  { %v157_v11 = vmul.f32 %v156_v8, %v1796_v0  ;;  %v158_v12 = vmul.f32 %v156_v8, %v1801_v1  ;;  %v159_v15 = vmul.f32 %v156_v8, %v1806_v2  ;;  %v160_v16 = vmul.f32 %v156_v8, %v1811_v3  ;;  %v1904_v51 = vld [vmem:[%s2908_s0 + $0x80] sm:$0x7f]  ;;  %v1909_v52 = vld [vmem:[%s2908_s0 + $0x88] sm:$0x7f]  ;;  %v1914_v56 = vld [vmem:[%s2908_s0 + $0x90] sm:$0x7f] }
   0xe   :  { %v161_v17 = vmul.f32 %v156_v8, %v1816_v4  ;;  %v162_v18 = vmul.f32 %v156_v8, %v1821_v5  ;;  %v163_v19 = vmul.f32 %v156_v8, %v1826_v6  ;;  %v164_v20 = vmul.f32 %v156_v8, %v1831_v7  ;;  %v1919_v57 = vld [vmem:[%s2908_s0 + $0x98] sm:$0x7f]  ;;  %s1922_s5 = sld [smem:[#allocation2 + $0x5]] }
   0xf   :  { %v174_v21 = vstv %s1633_s17  ;;  %v208_v22 = vstv %s1634_s18  ;;  %s1926_s6 = sld [smem:[#allocation2 + $0x6]]  ;;  %vm1520_vm3 = vcmask 1044480   ;;  %vm1517_vm4 = vcmask 1043456  }
  0x10   :  { %v175_v23 = vmul.f32 %v174_v21, %v1806_v2  ;;  %v176_v24 = vmul.f32 %v174_v21, %v1811_v3  ;;  %v177_v25 = vmul.f32 %v174_v21, %v1836_v9  ;;  %v178_v26 = vmul.f32 %v174_v21, %v1841_v10  ;;  %s1971_s16 = sld [smem:[#allocation2 + $0x8]] }
  0x11   :  { %v179_v29 = vmul.f32 %v174_v21, %v1826_v6  ;;  %v180_v30 = vmul.f32 %v174_v21, %v1831_v7  ;;  %v181_v31 = vmul.f32 %v174_v21, %v1848_v13  ;;  %v182_v32 = vmul.f32 %v174_v21, %v1853_v14  ;;  %s2024_s28 = sld [smem:[#allocation2 + $0x12]] }
  0x12   :  { %v183_v34 = vadd.f32 %v175_v23, %v157_v11  ;;  %v184_v35 = vadd.f32 %v176_v24, %v158_v12  ;;  %v185_v36 = vadd.f32 %v177_v25, %v159_v15  ;;  %v186_v38 = vadd.f32 %v178_v26, %v160_v16  ;;  %v1942_v25 = vld [vmem:[%s2908_s0 + $0xa8] sm:$0x7f]  ;;  %s1653_s7 = sld [smem:[#allocation2 + $0x15]] }
  0x13   :  { %v187_v39 = vadd.f32 %v179_v29, %v161_v17  ;;  %v188_v40 = vadd.f32 %v180_v30, %v162_v18  ;;  %v189_v41 = vadd.f32 %v181_v31, %v163_v19  ;;  %v209_v42 = vmul.f32 %v208_v22, %v1836_v9  ;;  %s1654_s9 = sld [smem:[#allocation2 + $0x16]] }
  0x14   :  { %v210_v43 = vmul.f32 %v208_v22, %v1841_v10  ;;  %v211_v44 = vmul.f32 %v208_v22, %v1870_v27  ;;  %v212_v45 = vmul.f32 %v208_v22, %v1875_v28  ;;  %v190_v46 = vadd.f32 %v182_v32, %v164_v20  ;;  %v1937_v20 = vld [vmem:[%s2908_s0 + $0xa0] sm:$0x7f]  ;;  %s1707_s10 = sld [smem:[#allocation2 + $0x4b]] }
  0x15   :  { %v213_v47 = vmul.f32 %v208_v22, %v1848_v13  ;;  %v214_v48 = vmul.f32 %v208_v22, %v1853_v14  ;;  %v215_v49 = vmul.f32 %v208_v22, %v1884_v33  ;;  %v216_v50 = vmul.f32 %v208_v22, %v1889_v37  ;;  %2918 = vst [vmem:[#allocation5_spill] sm:$0xff] %v1937_v20  ;;  %s1672_s11 = sld [smem:[#allocation2 + $0x28]] }
  0x16   :  { %v217_v53 = vadd.f32 %v209_v42, %v183_v34  ;;  %v218_v54 = vadd.f32 %v210_v43, %v184_v35  ;;  %v219_v55 = vadd.f32 %v211_v44, %v185_v36  ;;  %v220_v58 = vadd.f32 %v212_v45, %v186_v38  ;;  %v1956_v45 = vld [vmem:[%s2908_s0 + $0xb0] sm:$0x7f]  ;;  %s1708_s13 = sld [smem:[#allocation2 + $0x4c]] }
  0x17   :  { %v221_v59 = vadd.f32 %v213_v47, %v187_v39  ;;  %v222_v60 = vadd.f32 %v214_v48, %v188_v40  ;;  %v242_v61 = vstv %s1861_s15  ;;  %v223_v62 = vadd.f32 %v215_v49, %v189_v41  ;;  %s1965_s15 = sld [smem:[#allocation2 + $0x7]] }
  0x18   :  { %v224_v63 = vadd.f32 %v216_v50, %v190_v46  ;;  %v243_v8 = vmul.f32 %v242_v61, %v1816_v4  ;;  %v244_v11 = vmul.f32 %v242_v61, %v1821_v5  ;;  %v245_v12 = vmul.f32 %v242_v61, %v1826_v6  ;;  %v1961_v46 = vld [vmem:[%s2908_s0 + $0xb8] sm:$0x7f]  ;;  %s1690_s14 = sld [smem:[#allocation2 + $0x3a]] }
  0x19   :  { %v246_v15 = vmul.f32 %v242_v61, %v1831_v7  ;;  %v247_v16 = vmul.f32 %v242_v61, %v1904_v51  ;;  %v248_v17 = vmul.f32 %v242_v61, %v1909_v52  ;;  %v249_v18 = vmul.f32 %v242_v61, %v1914_v56  ;;  %s1674_s19 = sld [smem:[#allocation2 + $0x2a]] }
  0x1a   :  { %v250_v19 = vmul.f32 %v242_v61, %v1919_v57  ;;  %v251_v21 = vadd.f32 %v243_v8, %v217_v53  ;;  %v252_v22 = vadd.f32 %v244_v11, %v218_v54  ;;  %v253_v23 = vadd.f32 %v245_v12, %v219_v55  ;;  %s1710_s20 = sld [smem:[#allocation2 + $0x4e]] }
  0x1b   :  { %v254_v24 = vadd.f32 %v246_v15, %v220_v58  ;;  %v255_v26 = vadd.f32 %v247_v16, %v221_v59  ;;  %v256_v29 = vadd.f32 %v248_v17, %v222_v60  ;;  %v257_v30 = vadd.f32 %v249_v18, %v223_v62  ;;  %v1980_v15 = vld [vmem:[%s2908_s0 + $0xc0] sm:$0x7f]  ;;  %v1985_v16 = vld [vmem:[%s2908_s0 + $0xc8] sm:$0x7f]  ;;  %v1990_v17 = vld [vmem:[%s2908_s0 + $0xd0] sm:$0x7f] }
  0x1c   :  { %v276_v31 = vstv %s1895_s23  ;;  %v258_v32 = vadd.f32 %v250_v19, %v224_v63  ;;  %v310_v55 = vstv %s1922_s5  ;;  %v344_v58 = vstv %s1926_s6  ;;  %2919 = vst [vmem:[#allocation6_spill] sm:$0xff] %v1990_v17  ;;  %s1671_s6 = sld [smem:[#allocation2 + $0x27]] }
  0x1d   :  { %v277_v34 = vmul.f32 %v276_v31, %v1826_v6  ;;  %v278_v35 = vmul.f32 %v276_v31, %v1831_v7  ;;  %v279_v36 = vmul.f32 %v276_v31, %v1848_v13  ;;  %v280_v38 = vmul.f32 %v276_v31, %v1853_v14  ;;  %s1641_s21 = sld [smem:[#allocation2 + $0x9]] }
  0x1e   :  { %v281_v39 = vmul.f32 %v276_v31, %v1914_v56  ;;  %v282_v40 = vmul.f32 %v276_v31, %v1919_v57  ;;  %v283_v41 = vmul.f32 %v276_v31, %v1937_v20  ;;  %v284_v42 = vmul.f32 %v276_v31, %v1942_v25  ;;  %s1643_s17 = sld [smem:[#allocation2 + $0xb]] }
  0x1f   :  { %v285_v43 = vadd.f32 %v277_v34, %v251_v21  ;;  %v286_v44 = vadd.f32 %v278_v35, %v252_v22  ;;  %v287_v47 = vadd.f32 %v279_v36, %v253_v23  ;;  %v288_v48 = vadd.f32 %v280_v38, %v254_v24  ;;  %v1995_v22 = vld [vmem:[%s2908_s0 + $0xd8] sm:$0x7f]  ;;  %s1642_s18 = sld [smem:[#allocation2 + $0xa]] }
  0x20   :  { %v289_v49 = vadd.f32 %v281_v39, %v255_v26  ;;  %v290_v50 = vadd.f32 %v282_v40, %v256_v29  ;;  %v291_v53 = vadd.f32 %v283_v41, %v257_v30  ;;  %v292_v54 = vadd.f32 %v284_v42, %v258_v32  ;;  %v2008_v42 = vld [vmem:[%s2908_s0 + $0xe0] sm:$0x7f]  ;;  %s2092_s22 = sld [smem:[#allocation2 + $0x2b]] }
  0x21   :  { %v311_v59 = vmul.f32 %v310_v55, %v1848_v13  ;;  %v312_v60 = vmul.f32 %v310_v55, %v1853_v14  ;;  %v313_v61 = vmul.f32 %v310_v55, %v1884_v33  ;;  %v314_v62 = vmul.f32 %v310_v55, %v1889_v37  ;;  %2920 = vst [vmem:[#allocation7_spill] sm:$0xff] %v2008_v42  ;;  %s2094_s1 = sld [smem:[#allocation2 + $0x19]] }
  0x22   :  { %v315_v63 = vmul.f32 %v310_v55, %v1937_v20  ;;  %v316_v8 = vmul.f32 %v310_v55, %v1942_v25  ;;  %v317_v11 = vmul.f32 %v310_v55, %v1956_v45  ;;  %v318_v12 = vmul.f32 %v310_v55, %v1961_v46  ;;  %s2096_s23 = sld [smem:[#allocation2 + $0xc]] }
  0x23   :  { %v319_v18 = vadd.f32 %v311_v59, %v285_v43  ;;  %v320_v19 = vadd.f32 %v312_v60, %v286_v44  ;;  %v321_v21 = vadd.f32 %v313_v61, %v287_v47  ;;  %v322_v23 = vadd.f32 %v314_v62, %v288_v48  ;;  %s2114_s24 = sld [smem:[#allocation2 + $0xd]] }
  0x24   :  { %v323_v24 = vadd.f32 %v315_v63, %v289_v49  ;;  %v324_v26 = vadd.f32 %v316_v8, %v290_v50  ;;  %v325_v29 = vadd.f32 %v317_v11, %v291_v53  ;;  %v326_v30 = vadd.f32 %v318_v12, %v292_v54  ;;  %v2013_v49 = vld [vmem:[%s2908_s0 + $0xe8] sm:$0x7f]  ;;  %v2029_v12 = vld [vmem:[%s2908_s0 + $0xf0] sm:$0x7f]  ;;  %s2121_s25 = sld [smem:[#allocation2 + $0x3d]] }
  0x25   :  { %v345_v31 = vmul.f32 %v344_v58, %v1904_v51  ;;  %v346_v32 = vmul.f32 %v344_v58, %v1909_v52  ;;  %v347_v34 = vmul.f32 %v344_v58, %v1914_v56  ;;  %v348_v35 = vmul.f32 %v344_v58, %v1919_v57  ;;  %s2129_s26 = sld [smem:[#allocation2 + $0xe]] }
  0x26   :  { %v349_v36 = vmul.f32 %v344_v58, %v1980_v15  ;;  %v350_v38 = vmul.f32 %v344_v58, %v1985_v16  ;;  %v351_v39 = vmul.f32 %v344_v58, %v1990_v17  ;;  %v352_v40 = vmul.f32 %v344_v58, %v1995_v22  ;;  %s2139_s27 = sld [smem:[#allocation2 + $0xf]] }
  0x27   :  { %v353_v41 = vadd.f32 %v345_v31, %v319_v18  ;;  %v354_v43 = vadd.f32 %v346_v32, %v320_v19  ;;  %v355_v44 = vadd.f32 %v347_v34, %v321_v21  ;;  %v356_v47 = vadd.f32 %v348_v35, %v322_v23  ;;  %s2161_s29 = sld [smem:[#allocation2 + $0x4f]] }
  0x28   :  { %v357_v48 = vadd.f32 %v349_v36, %v323_v24  ;;  %v358_v50 = vadd.f32 %v350_v38, %v324_v26  ;;  %v359_v53 = vadd.f32 %v351_v39, %v325_v29  ;;  %v360_v54 = vadd.f32 %v352_v40, %v326_v30  ;;  %v2035_v24 = vld [vmem:[%s2908_s0 + $0xf8] sm:$0x7f]  ;;  %s1689_s0 = sld [smem:[#allocation2 + $0x39]] }
  0x29   :  { %v378_v55 = vstv %s1965_s15  ;;  %v412_v61 = vstv %s1971_s16  ;;  %s1656_s15 = sld [smem:[#allocation2 + $0x18]]  ;;  %vm1523_vm5 = vcmask 1045504   ;;  %vm1526_vm6 = vcmask 1046528  }
  0x2a   :  { %v379_v58 = vmul.f32 %v378_v55, %v1914_v56  ;;  %v380_v59 = vmul.f32 %v378_v55, %v1919_v57  ;;  %v381_v60 = vmul.f32 %v378_v55, %v1937_v20  ;;  %v382_v62 = vmul.f32 %v378_v55, %v1942_v25  ;;  %s2076_s16 = sld [smem:[#allocation2 + $0x3c]] }
  0x2b   :  { %v383_v63 = vmul.f32 %v378_v55, %v1990_v17  ;;  %v384_v8 = vmul.f32 %v378_v55, %v1995_v22  ;;  %v385_v11 = vmul.f32 %v378_v55, %v2008_v42  ;;  %v386_v18 = vmul.f32 %v378_v55, %v2013_v49  ;;  %s2170_s30 = sld [smem:[#allocation2 + $0x10]] }
  0x2c   :  { %v387_v19 = vadd.f32 %v379_v58, %v353_v41  ;;  %v388_v21 = vadd.f32 %v380_v59, %v354_v43  ;;  %v389_v23 = vadd.f32 %v381_v60, %v355_v44  ;;  %v390_v26 = vadd.f32 %v382_v62, %v356_v47  ;;  %s2194_s4 = sld [smem:[#allocation2 + $0x11]] }
  0x2d   :  { %v391_v29 = vadd.f32 %v383_v63, %v357_v48  ;;  %v392_v30 = vadd.f32 %v384_v8, %v358_v50  ;;  %v393_v31 = vadd.f32 %v385_v11, %v359_v53  ;;  %v394_v32 = vadd.f32 %v386_v18, %v360_v54  ;;  %s2206_s5 = sld [smem:[#allocation2 + $0x3f]] }
  0x2e   :  { %v413_v34 = vmul.f32 %v412_v61, %v1937_v20  ;;  %v414_v35 = vmul.f32 %v412_v61, %v1942_v25  ;;  %v415_v36 = vmul.f32 %v412_v61, %v1956_v45  ;;  %v416_v38 = vmul.f32 %v412_v61, %v1961_v46 }
  0x2f   :  { %v417_v39 = vmul.f32 %v412_v61, %v2008_v42  ;;  %v418_v40 = vmul.f32 %v412_v61, %v2013_v49  ;;  %v419_v41 = vmul.f32 %v412_v61, %v2029_v12  ;;  %v420_v43 = vmul.f32 %v412_v61, %v2035_v24 }
  0x30   :  { %v421_v44 = vadd.f32 %v413_v34, %v387_v19  ;;  %v422_v47 = vadd.f32 %v414_v35, %v388_v21  ;;  %v423_v48 = vadd.f32 %v415_v36, %v389_v23  ;;  %v424_v50 = vadd.f32 %v416_v38, %v390_v26 }
  0x31   :  { %v425_v53 = vadd.f32 %v417_v39, %v391_v29  ;;  %v426_v54 = vadd.f32 %v418_v40, %v392_v30  ;;  %v427_v55 = vadd.f32 %v419_v41, %v393_v31  ;;  %v428_v58 = vadd.f32 %v420_v43, %v394_v32 }
  0x32   :  { %v446_v59 = vmax.f32 %v421_v44, %v423_v48  ;;  %v447_v60 = vmax.f32 %v422_v47, %v424_v50  ;;  %v452_v8 = vstv %s2024_s28  ;;  %v518_v26 = vstv %s1689_s0  ;;  %s2157_s28 = sld [smem:[#allocation2 + $0x1b]] }
  0x33   :  { %v448_v62 = vmax.f32 %v425_v53, %v427_v55  ;;  %v449_v63 = vmax.f32 %v426_v54, %v428_v58  ;;  %v505_v29 = vstv %s1671_s6  ;;  %v492_v30 = vstv %s1653_s7  ;;  %s2263_s0 = sld [smem:[#allocation2 + $0x2d]] }
  0x34   :  { %v544_v39 = vstv %s1654_s9  ;;  %v531_v40 = vstv %s1707_s10  ;;  %v557_v47 = vstv %s1672_s11  ;;  %v583_v54 = vstv %s1708_s13  ;;  %s2266_s6 = sld [smem:[#allocation2 + $0x40]] }
  0x35   :  { %v450_v11 = vmax.f32 %v446_v59, %v448_v62  ;;  %v451_v18 = vmax.f32 %v447_v60, %v449_v63  ;;  %v570_v55 = vstv %s1690_s14  ;;  %v640_v62 = vstv %s1656_s15  ;;  %s2272_s7 = sld [smem:[#allocation2 + $0x1c]] }
  0x36   :  { %s2305_s9 = sld [smem:[#allocation2 + $0x13]]  ;;  %vm1586_vm7 = vcmask 31744   ;;  %vm1616_vm8 = vcmask 1041409   ;;  %vm1619_vm9 = vcmask 25600   ;;  %vm1626_vm10 = vcmask 1024  }
  0x37   :  { %v453_v42 = vadd.f32 %v452_v8, %v450_v11  ;;  %v454_v17 = vadd.f32 %v452_v8, %v451_v18  ;;  %s2324_s10 = sld [smem:[#allocation2 + $0x51]] }
  0x38   :  { %s2363_s11 = sld [smem:[#allocation2 + $0x2e]] }
  0x39   :  { %v455_v20 = vmul.f32 0.5, %v453_v42  ;;  %v456_v61 = vmul.f32 0.5, %v454_v17  ;;  %s2385_s13 = sld [smem:[#allocation2 + $0x14]] }
  0x3a   :  { %s2387_s14 = sld [smem:[#allocation2 + $0x52]] }
  0x3b   :  { %1736 = vtanh.f32 %v455_v20  ;;  %s2393_s15 = sld [smem:[#allocation2 + $0x42]] }
  0x3c   :  { %1738 = vtanh.f32 %v456_v61 }
  0x41   :  { %v1737_v19 = vpop.eup %1736 }
  0x42   :  { %v1739_v21 = vpop.eup %1738  ;;  %v459_v23 = vadd.f32 1.0, %v1737_v19  ;;  %v670_v19 = vstv %s2076_s16  ;;  %s2399_s16 = sld [smem:[#allocation2 + $0x1e]] }
  0x43   :  { %v460_v31 = vadd.f32 1.0, %v1739_v21  ;;  %v655_v21 = vstv %s1674_s19  ;;  %s2402_s19 = sld [smem:[#allocation2 + $0x26]] }
  0x44   :  { %v2046_v32 = vmul.f32 0.5, %v459_v23 }
  0x45   :  { %v2051_v17 = vmul.f32 0.5, %v460_v31 }
  0x46   :  { %v519_v34 = vmul.f32 %v518_v26, %v2046_v32  ;;  %v506_v35 = vmul.f32 %v505_v29, %v2046_v32  ;;  %v493_v42 = vmul.f32 %v492_v30, %v2046_v32  ;;  %v545_v41 = vmul.f32 %v544_v39, %v2046_v32 }
  0x47   :  { %v520_v20 = vmul.f32 %v518_v26, %v2051_v17  ;;  %v507_v36 = vmul.f32 %v505_v29, %v2051_v17  ;;  %v494_v38 = vmul.f32 %v492_v30, %v2051_v17  ;;  %v533_v43 = vmul.f32 %v531_v40, %v2051_v17 }
  0x48   :  { %523 = vrot.lane.b32.xlu2 %v519_v34, %s1767_s8  ;;  %510 = vrot.lane.b32.xlu1 %v506_v35, %s1767_s8  ;;  %v532_v44 = vmul.f32 %v531_v40, %v2046_v32  ;;  %v559_v48 = vmul.f32 %v557_v47, %v2051_v17  ;;  %v558_v50 = vmul.f32 %v557_v47, %v2046_v32  ;;  %v685_v30 = vstv %s1710_s20  ;;  %s2420_s20 = sld [smem:[#allocation2 + $0x4a]] }
  0x49   :  { %497 = vrot.lane.b32.xlu0 %v493_v42, %s1767_s8  ;;  %v546_v53 = vmul.f32 %v544_v39, %v2051_v17  ;;  %v584_v58 = vmul.f32 %v583_v54, %v2046_v32  ;;  %v572_v59 = vmul.f32 %v570_v55, %v2051_v17  ;;  %v571_v60 = vmul.f32 %v570_v55, %v2046_v32 }
  0x4a   :  { %v642_v63 = vmul.f32 %v640_v62, %v2051_v17  ;;  %v641_v8 = vmul.f32 %v640_v62, %v2046_v32  ;;  %v585_v61 = vmul.f32 %v583_v54, %v2051_v17  ;;  %v671_v23 = vmul.f32 %v670_v19, %v2046_v32 }
  0x4b   :  { %v657_v26 = vmul.f32 %v655_v21, %v2051_v17  ;;  %v656_v29 = vmul.f32 %v655_v21, %v2046_v32  ;;  %v687_v42 = vmul.f32 %v685_v30, %v2051_v17  ;;  %v2118_v47 = vstv %s1642_s18  ;;  %s2436_s18 = sld [smem:[#allocation2 + $0x17]] }
  0x4c   :  { %v646_v11 = vrot.slane %v642_v63, 1  ;;  %v645_v18 = vrot.slane %v641_v8, 1  ;;  %v675_v31 = vrot.slane %v671_v23, 1  ;;  %v193_v54 = vmul.f32 %v2118_v47, %v1811_v3 }
  0x4d   :  { %v661_v34 = vrot.slane %v657_v26, 1  ;;  %v660_v35 = vrot.slane %v656_v29, 1  ;;  %v195_v55 = vmul.f32 %v2118_v47, %v1841_v10  ;;  %v2149_v63 = vstv %s2096_s23  ;;  %s2453_s23 = sld [smem:[#allocation2 + $0x30]] }
  0x50   :  { %525 = vrot.lane.b32.xlu2 %v520_v20, %s1767_s8  ;;  %512 = vrot.lane.b32.xlu1 %v507_v36, %s1767_s8  ;;  %v686_v20 = vmul.f32 %v685_v30, %v2046_v32  ;;  %v2100_v36 = vstv %s1641_s21  ;;  %s2427_s21 = sld [smem:[#allocation2 + $0x43]] }
  0x51   :  { %499 = vrot.lane.b32.xlu0 %v494_v38, %s1767_s8  ;;  %v2102_v38 = vstv %s1643_s17  ;;  %v2106_v39 = vmul.f32 %v2100_v36, %v1796_v0  ;;  %v715_v0 = vstv %s2092_s22  ;;  %s2431_s17 = sld [smem:[#allocation2 + $0x1f]] }
  0x52   :  { %v2110_v40 = vmul.f32 %v2102_v38, %v1870_v27  ;;  %v167_v27 = vmul.f32 %v2100_v36, %v1801_v1  ;;  %v197_v1 = vmul.f32 %v2118_v47, %v1831_v7  ;;  %v229_v62 = vmul.f32 %v2102_v38, %v1875_v28  ;;  %s2439_s22 = sld [smem:[#allocation2 + $0x38]] }
  0x53   :  { %v233_v21 = vmul.f32 %v2102_v38, %v1889_v37  ;;  %v716_v23 = vmul.f32 %v715_v0, %v2046_v32 }
  0x54   :  { %v201_v8 = vadd.f32 %v193_v54, %v167_v27 }
  0x58   :  { %549 = vrot.lane.b32.xlu2 %v545_v41, %s1768_s12  ;;  %538 = vrot.lane.b32.xlu1 %v533_v43, %s1767_s8  ;;  %v691_v41 = vrot.slane %v687_v42, 1  ;;  %v690_v43 = vrot.slane %v686_v20, 1  ;;  %v263_v42 = vmul.f32 %v2149_v63, %v1831_v7  ;;  %v265_v20 = vmul.f32 %v2149_v63, %v1909_v52 }
  0x59   :  { %536 = vrot.lane.b32.xlu0 %v532_v44, %s1767_s8  ;;  %v672_v44 = vmul.f32 %v670_v19, %v2051_v17  ;;  %v231_v19 = vmul.f32 %v2102_v38, %v1853_v14 }
  0x60   :  { %564 = vrot.lane.b32.xlu2 %v559_v48, %s1768_s12  ;;  %562 = vrot.lane.b32.xlu1 %v558_v50, %s1768_s12  ;;  %v169_v48 = vmul.f32 %v2100_v36, %v1811_v3  ;;  %v171_v50 = vmul.f32 %v2100_v36, %v1821_v5  ;;  %v676_v3 = vrot.slane %v672_v44, 1 }
  0x61   :  { %551 = vrot.lane.b32.xlu0 %v546_v53, %s1768_s12  ;;  %v173_v53 = vmul.f32 %v2100_v36, %v1831_v7 }
  0x68   :  { %588 = vrot.lane.b32.xlu2 %v584_v58, %s1768_s12  ;;  %577 = vrot.lane.b32.xlu1 %v572_v59, %s1768_s12  ;;  %v700_v58 = vstv %s2094_s1  ;;  %v199_v59 = vmul.f32 %v2118_v47, %v1853_v14  ;;  %s2449_s1 = sld [smem:[#allocation2 + $0x54]] }
  0x69   :  { %575 = vrot.lane.b32.xlu0 %v571_v60, %s1768_s12  ;;  %v227_v60 = vmul.f32 %v2102_v38, %v1841_v10  ;;  %v702_v10 = vmul.f32 %v700_v58, %v2051_v17 }
  0x6b   :  { %v235_v28 = vadd.f32 %v227_v60, %v201_v8 }
  0x70   :  { %649 = vrot.lane.b32.xlu2 %v646_v11, %s1767_s8  ;;  %647 = vrot.lane.b32.xlu1 %v645_v18, %s1767_s8  ;;  %v203_v11 = vadd.f32 %v195_v55, %v169_v48  ;;  %v205_v18 = vadd.f32 %v197_v1, %v171_v50  ;;  %v2184_v48 = vstv %s2129_s26  ;;  %v2187_v55 = vstv %s2139_s27  ;;  %s2481_s26 = sld [smem:[#allocation2 + $0x21]] }
  0x71   :  { %590 = vrot.lane.b32.xlu0 %v585_v61, %s1768_s12  ;;  %v207_v61 = vadd.f32 %v199_v59, %v173_v53  ;;  %v720_v1 = vrot.slane %v716_v23, 1  ;;  %s2487_s27 = sld [smem:[#allocation2 + $0x29]] }
  0x72   :  { %v237_v26 = vadd.f32 %v229_v62, %v203_v11  ;;  %v239_v29 = vadd.f32 %v231_v19, %v205_v18  ;;  %v717_v19 = vmul.f32 %v715_v0, %v2051_v17 }
  0x73   :  { %v241_v30 = vadd.f32 %v233_v21, %v207_v61  ;;  %v329_v61 = vmul.f32 %v2184_v48, %v1853_v14  ;;  %v804_v21 = vstv %s2157_s28  ;;  %s2496_s28 = sld [smem:[#allocation2 + $0x55]] }
  0x74   :  { %v271_v50 = vadd.f32 %v263_v42, %v237_v26  ;;  %v273_v53 = vadd.f32 %v265_v20, %v239_v29  ;;  %v333_v26 = vmul.f32 %v2184_v48, %v1942_v25  ;;  %v367_v20 = vmul.f32 %v2187_v55, %v1985_v16 }
  0x78   :  { %677 = vrot.lane.b32.xlu2 %v675_v31, %s1767_s8  ;;  %664 = vrot.lane.b32.xlu1 %v661_v34, %s1767_s8  ;;  %v261_v31 = vmul.f32 %v2149_v63, %v1821_v5  ;;  %v2166_v34 = vstv %s2114_s24  ;;  %s2455_s24 = sld [smem:[#allocation2 + $0x3b]] }
  0x79   :  { %662 = vrot.lane.b32.xlu0 %v660_v35, %s1767_s8  ;;  %v701_v35 = vmul.f32 %v700_v58, %v2046_v32  ;;  %v295_v44 = vmul.f32 %v2166_v34, %v1831_v7  ;;  %v297_v27 = vmul.f32 %v2166_v34, %v1853_v14  ;;  %v706_v58 = vrot.slane %v702_v10, 1 }
  0x7a   :  { %v269_v5 = vadd.f32 %v261_v31, %v235_v28  ;;  %v299_v59 = vmul.f32 %v2166_v34, %v1919_v57  ;;  %v301_v62 = vmul.f32 %v2166_v34, %v1942_v25  ;;  %v331_v10 = vmul.f32 %v2184_v48, %v1889_v37 }
  0x7b   :  { %v705_v60 = vrot.slane %v701_v35, 1  ;;  %v305_v11 = vadd.f32 %v297_v27, %v271_v50  ;;  %v745_v28 = vstv %s2161_s29  ;;  %v335_v14 = vmul.f32 %v2184_v48, %v1961_v46  ;;  %s2499_s29 = sld [smem:[#allocation2 + $0x31]] }
  0x7c   :  { %v307_v18 = vadd.f32 %v299_v59, %v273_v53  ;;  %v363_v37 = vmul.f32 %v2187_v55, %v1909_v52  ;;  %v2218_v31 = vstv %s2170_s30  ;;  %v721_v27 = vrot.slane %v717_v19, 1  ;;  %s2513_s30 = sld [smem:[#allocation2 + $0x45]] }
  0x7d   :  { %v339_v29 = vadd.f32 %v331_v10, %v305_v11  ;;  %v747_v50 = vmul.f32 %v745_v28, %v2051_v17  ;;  %v401_v59 = vmul.f32 %v2218_v31, %v1995_v22  ;;  %v834_v19 = vstv %s2206_s5  ;;  %s2546_s5 = sld [smem:[#allocation2 + $0x1a]] }
  0x7e   :  { %v341_v35 = vadd.f32 %v333_v26, %v307_v18 }
  0x7f   :  { %v751_v18 = vrot.slane %v747_v50, 1 }
  0x80   :  { %694 = vrot.lane.b32.xlu2 %v691_v41, %s1767_s8  ;;  %692 = vrot.lane.b32.xlu1 %v690_v43, %s1767_s8  ;;  %v267_v41 = vmul.f32 %v2149_v63, %v1919_v57  ;;  %v730_v43 = vstv %s2121_s25  ;;  %s2477_s25 = sld [smem:[#allocation2 + $0x4d]] }
  0x81   :  { %679 = vrot.lane.b32.xlu0 %v676_v3, %s1767_s8  ;;  %v732_v7 = vmul.f32 %v730_v43, %v2051_v17  ;;  %v303_v3 = vadd.f32 %v295_v44, %v269_v5  ;;  %v731_v8 = vmul.f32 %v730_v43, %v2046_v32  ;;  %v2226_v43 = vmul.f32 %v2102_v38, %v1884_v33 }
  0x82   :  { %v275_v54 = vadd.f32 %v267_v41, %v241_v30  ;;  %v365_v30 = vmul.f32 %v2187_v55, %v1919_v57  ;;  %v369_v41 = vmul.f32 %v2187_v55, %v1995_v22  ;;  %v806_v44 = vmul.f32 %v804_v21, %v2051_v17 }
  0x83   :  { %v337_v0 = vadd.f32 %v329_v61, %v303_v3  ;;  %v736_v5 = vrot.slane %v732_v7, 1  ;;  %v735_v52 = vrot.slane %v731_v8, 1  ;;  %v2243_v7 = vstv %s2194_s4  ;;  %s2531_s4 = sld [smem:[#allocation2 + $0x22]] }
  0x84   :  { %v309_v23 = vadd.f32 %v301_v62, %v275_v54  ;;  %v397_v54 = vmul.f32 %v2218_v31, %v1919_v57  ;;  %v373_v16 = vadd.f32 %v365_v30, %v339_v29  ;;  %v403_v3 = vmul.f32 %v2218_v31, %v2013_v49 }
  0x85   :  { %v371_v53 = vadd.f32 %v363_v37, %v337_v0  ;;  %v2249_v57 = vmul.f32 %v2184_v48, %v1956_v45  ;;  %v2253_v8 = vmul.f32 %v2187_v55, %v1980_v15  ;;  %v2257_v22 = vmul.f32 %v2243_v7, %v2029_v12 }
  0x86   :  { %v343_v42 = vadd.f32 %v335_v14, %v309_v23  ;;  %v810_v11 = vrot.slane %v806_v44, 2  ;;  %v746_v61 = vmul.f32 %v745_v28, %v2046_v32  ;;  %v431_v12 = vmul.f32 %v2243_v7, %v1942_v25 }
  0x87   :  { %v405_v23 = vadd.f32 %v397_v54, %v371_v53  ;;  %v433_v26 = vmul.f32 %v2243_v7, %v1961_v46  ;;  %v168_v14 = vmul.f32 %v2100_v36, %v1806_v2  ;;  %v170_v0 = vmul.f32 %v2100_v36, %v1816_v4 }
  0x88   :  { %722 = vrot.lane.b32.xlu2 %v720_v1, %s1768_s12  ;;  %709 = vrot.lane.b32.xlu1 %v706_v58, %s1768_s12  ;;  %v375_v1 = vadd.f32 %v367_v20, %v341_v35  ;;  %v399_v58 = vmul.f32 %v2218_v31, %v1942_v25  ;;  %v377_v62 = vadd.f32 %v369_v41, %v343_v42  ;;  %v750_v35 = vrot.slane %v746_v61, 1 }
  0x89   :  { %707 = vrot.lane.b32.xlu0 %v705_v60, %s1768_s12  ;;  %v2240_v60 = vmul.f32 %v2149_v63, %v1904_v51  ;;  %v172_v29 = vmul.f32 %v2100_v36, %v1826_v6  ;;  %v435_v37 = vmul.f32 %v2243_v7, %v2013_v49  ;;  %v437_v25 = vmul.f32 %v2243_v7, %v2035_v24 }
  0x8a   :  { %v407_v15 = vadd.f32 %v399_v58, %v373_v16  ;;  %v409_v10 = vadd.f32 %v401_v59, %v375_v1  ;;  %v411_v28 = vadd.f32 %v403_v3, %v377_v62  ;;  %v192_v46 = vmul.f32 %v2118_v47, %v1806_v2 }
  0x8b   :  { %v194_v30 = vmul.f32 %v2118_v47, %v1836_v9  ;;  %v196_v42 = vmul.f32 %v2118_v47, %v1826_v6  ;;  %v198_v20 = vmul.f32 %v2118_v47, %v1848_v13  ;;  %v226_v36 = vmul.f32 %v2102_v38, %v1836_v9 }
  0x8c   :  { %v835_v49 = vmul.f32 %v834_v19, %v2046_v32  ;;  %v805_v24 = vmul.f32 %v804_v21, %v2046_v32  ;;  %v439_v2 = vadd.f32 %v431_v12, %v405_v23  ;;  %v200_v41 = vadd.f32 %v192_v46, %v2106_v39 }
  0x8d   :  { %v204_v44 = vadd.f32 %v196_v42, %v170_v0  ;;  %v443_v50 = vadd.f32 %v435_v37, %v409_v10  ;;  %v445_v47 = vadd.f32 %v437_v25, %v411_v28  ;;  %v230_v9 = vmul.f32 %v2102_v38, %v1848_v13 }
  0x8e   :  { %v234_v53 = vadd.f32 %v226_v36, %v200_v41  ;;  %v836_v21 = vmul.f32 %v834_v19, %v2051_v17  ;;  %v819_v54 = vstv %s2263_s0  ;;  %v894_v1 = vstv %s2266_s6  ;;  %s2552_s0 = sld [smem:[#allocation2 + $0x57]] }
  0x8f   :  { %v238_v58 = vadd.f32 %v230_v9, %v204_v44  ;;  %v260_v38 = vmul.f32 %v2149_v63, %v1816_v4  ;;  %v262_v59 = vmul.f32 %v2149_v63, %v1826_v6  ;;  %v864_v62 = vstv %s2272_s7  ;;  %s2555_s6 = sld [smem:[#allocation2 + $0x33]] }
  0x90   :  { %739 = vrot.lane.b32.xlu2 %v736_v5, %s1768_s12  ;;  %737 = vrot.lane.b32.xlu1 %v735_v52, %s1768_s12  ;;  %v441_v5 = vadd.f32 %v433_v26, %v407_v15  ;;  %v202_v52 = vadd.f32 %v194_v30, %v168_v14  ;;  %v839_v23 = vrot.slane %v835_v49, 2  ;;  %v809_v15 = vrot.slane %v805_v24, 2  ;;  %v2921_v26 = vld [vmem:[#allocation5_spill] sm:$0xff]  ;;  %v2922_v24 = vld [vmem:[#allocation6_spill] sm:$0xff]  ;;  %s2559_s7 = sld [smem:[#allocation2 + $0x46]] }
  0x91   :  { %724 = vrot.lane.b32.xlu0 %v721_v27, %s1768_s12  ;;  %v206_v27 = vadd.f32 %v198_v20, %v172_v29  ;;  %v272_v19 = vadd.f32 %v2240_v60, %v238_v58  ;;  %v840_v4 = vrot.slane %v836_v21, 2  ;;  %v821_v12 = vmul.f32 %v819_v54, %v2051_v17 }
  0x92   :  { %v236_v39 = vadd.f32 %v2110_v40, %v202_v52  ;;  %v464_v3 = vmax.f32 %v439_v2, %v441_v5  ;;  %v294_v40 = vmul.f32 %v2166_v34, %v1826_v6  ;;  %v298_v6 = vmul.f32 %v2166_v34, %v1914_v56 }
  0x93   :  { %v240_v16 = vadd.f32 %v2226_v43, %v206_v27  ;;  %v466_v43 = vmax.f32 %v443_v50, %v445_v47  ;;  %v300_v28 = vmul.f32 %v2166_v34, %v2921_v26  ;;  %v896_v60 = vmul.f32 %v894_v1, %v2051_v17 }
  0x94   :  { %v270_v61 = vadd.f32 %v262_v59, %v236_v39  ;;  %v866_v14 = vmul.f32 %v864_v62, %v2051_v17  ;;  %v328_v29 = vmul.f32 %v2184_v48, %v1848_v13  ;;  %v306_v46 = vadd.f32 %v298_v6, %v272_v19  ;;  %v2923_v39 = vld [vmem:[#allocation7_spill] sm:$0xff] }
  0x95   :  { %v468_v37 = vmax.f32 %v464_v3, %v466_v43  ;;  %v332_v42 = vmul.f32 %v2184_v48, %v2921_v26  ;;  %v362_v36 = vmul.f32 %v2187_v55, %v1904_v51  ;;  %v364_v49 = vmul.f32 %v2187_v55, %v1914_v56 }
  0x96   :  { %v368_v2 = vmul.f32 %v2187_v55, %v2922_v24  ;;  %v396_v52 = vmul.f32 %v2218_v31, %v1914_v56  ;;  %v900_v44 = vrot.slane %v896_v60, 2  ;;  %v398_v9 = vmul.f32 %v2218_v31, %v2921_v26 }
  0x97   :  { %v400_v55 = vmul.f32 %v2218_v31, %v2922_v24  ;;  %v849_v21 = vstv %s2324_s10  ;;  %v432_v59 = vmul.f32 %v2243_v7, %v1956_v45  ;;  %v895_v3 = vmul.f32 %v894_v1, %v2046_v32  ;;  %s2579_s10 = sld [smem:[#allocation2 + $0x2c]] }
  0x98   :  { %813 = vrot.lane.b32.xlu2 %v810_v11, %s1767_s8  ;;  %754 = vrot.lane.b32.xlu1 %v751_v18, %s1768_s12  ;;  %v266_v11 = vmul.f32 %v2149_v63, %v1914_v56  ;;  %v268_v18 = vadd.f32 %v260_v38, %v234_v53  ;;  %v296_v63 = vmul.f32 %v2166_v34, %v1848_v13  ;;  %v870_v53 = vrot.slane %v866_v14, 2 }
  0x99   :  { %752 = vrot.lane.b32.xlu0 %v750_v35, %s1768_s12  ;;  %v469_v35 = vstv %s2305_s9  ;;  %v330_v34 = vmul.f32 %v2184_v48, %v1884_v33  ;;  %v825_v33 = vrot.slane %v821_v12, 2  ;;  %v340_v48 = vadd.f32 %v332_v42, %v306_v46  ;;  %s2572_s9 = sld [smem:[#allocation2 + $0x3e]] }
  0x9a   :  { %v274_v10 = vadd.f32 %v266_v11, %v240_v16  ;;  %v302_v0 = vadd.f32 %v294_v40, %v268_v18  ;;  %v304_v25 = vadd.f32 %v296_v63, %v270_v61  ;;  %v402_v56 = vmul.f32 %v2218_v31, %v2923_v39 }
  0x9b   :  { %v374_v47 = vadd.f32 %v2253_v8, %v340_v48  ;;  %v430_v8 = vmul.f32 %v2243_v7, %v2921_v26  ;;  %v434_v43 = vmul.f32 %v2243_v7, %v2923_v39  ;;  %v865_v31 = vmul.f32 %v864_v62, %v2046_v32 }
  0x9c   :  { %v308_v30 = vadd.f32 %v300_v28, %v274_v10  ;;  %v336_v20 = vadd.f32 %v328_v29, %v302_v0  ;;  %v338_v5 = vadd.f32 %v330_v34, %v304_v25  ;;  %v851_v45 = vmul.f32 %v849_v21, %v2051_v17 }
  0x9d   :  { %v408_v38 = vadd.f32 %v400_v55, %v374_v47  ;;  %v869_v10 = vrot.slane %v865_v31, 2  ;;  %v879_v63 = vstv %s2363_s11  ;;  %v850_v26 = vmul.f32 %v849_v21, %v2046_v32  ;;  %s2595_s11 = sld [smem:[#allocation2 + $0x58]] }
  0x9e   :  { %v342_v13 = vadd.f32 %v2249_v57, %v308_v30  ;;  %v471_v57 = vadd.f32 %v469_v35, %v468_v37  ;;  %v370_v27 = vadd.f32 %v362_v36, %v336_v20  ;;  %v372_v51 = vadd.f32 %v364_v49, %v338_v5 }
  0x9f   :  { %v442_v1 = vadd.f32 %v434_v43, %v408_v38  ;;  %v855_v12 = vrot.slane %v851_v45, 2  ;;  %v820_v60 = vmul.f32 %v819_v54, %v2046_v32  ;;  %v854_v37 = vrot.slane %v850_v26, 2 }
  0xa0   :  { %841 = vrot.lane.b32.xlu2 %v839_v23, %s1767_s8  ;;  %811 = vrot.lane.b32.xlu1 %v809_v15, %s1767_s8  ;;  %v376_v50 = vadd.f32 %v368_v2, %v342_v13  ;;  %v404_v16 = vadd.f32 %v396_v52, %v370_v27  ;;  %v406_v58 = vadd.f32 %v398_v9, %v372_v51  ;;  %v473_v11 = vmul.f32 0.5, %v471_v57 }
  0xa1   :  { %843 = vrot.lane.b32.xlu0 %v840_v4, %s1767_s8  ;;  %v899_v4 = vrot.slane %v895_v3, 2  ;;  %v824_v46 = vrot.slane %v820_v60, 2  ;;  %v480_v30 = vstv %s2385_s13  ;;  %v970_v20 = vstv %s2393_s15  ;;  %s2599_s13 = sld [smem:[#allocation2 + $0x34]] }
  0xa2   :  { %v2353_v41 = vpop.permute.xlu2 %523  ;;  %v410_v40 = vadd.f32 %v402_v56, %v376_v50  ;;  %v438_v18 = vadd.f32 %v430_v8, %v404_v16  ;;  %v440_v61 = vadd.f32 %v432_v59, %v406_v58  ;;  %1740 = vtanh.f32 %v473_v11  ;;  %s2618_s15 = sld [smem:[#allocation2 + $0x24]] }
  0xa3   :  { %v481_v54 = vmul.f32 %v480_v30, %v2046_v32  ;;  %v944_v13 = vstv %s2399_s16  ;;  %v483_v57 = vstv %s2402_s19  ;;  %v880_v9 = vmul.f32 %v879_v63, %v2046_v32  ;;  %s2640_s16 = sld [smem:[#allocation2 + $0x50]] }
  0xa4   :  { %v444_v19 = vadd.f32 %v2257_v22, %v410_v40  ;;  %v463_v7 = vmax.f32 %v438_v18, %v440_v61  ;;  %v881_v22 = vmul.f32 %v879_v63, %v2051_v17  ;;  %v485_v50 = vmul.f32 %v483_v57, %v2051_v17  ;;  %s2646_s19 = sld [smem:[#allocation2 + $0x41]] }
  0xa5   :  { %v884_v38 = vrot.slane %v880_v9, 2  ;;  %v489_v8 = vstv %s2420_s20  ;;  %v1022_v3 = vstv %s2427_s21  ;;  %v996_v11 = vstv %s2431_s17  ;;  %s2654_s20 = sld [smem:[#allocation2 + $0x36]] }
  0xa6   :  { %v465_v15 = vmax.f32 %v442_v1, %v444_v19  ;;  %v885_v29 = vrot.slane %v881_v22, 2  ;;  %v490_v59 = vmul.f32 %v489_v8, %v2046_v32  ;;  %v482_v18 = vmul.f32 %v480_v30, %v2051_v17  ;;  %s2656_s21 = sld [smem:[#allocation2 + $0x49]] }
  0xa7   :  { %v484_v19 = vmul.f32 %v483_v57, %v2046_v32  ;;  %v486_v60 = vstv %s2439_s22  ;;  %v629_v9 = vstv %s2477_s25  ;;  %s2658_s17 = sld [smem:[#allocation2 + $0x25]] }
  0xa8   :  { %828 = vrot.lane.b32.xlu2 %v825_v33, %s1767_s8  ;;  %903 = vrot.lane.b32.xlu1 %v900_v44, %s1768_s12  ;;  %v467_v62 = vmax.f32 %v463_v7, %v465_v15  ;;  %v1741_v28 = vpop.eup %1740  ;;  %v596_v15 = vstv %s2436_s18  ;;  %v488_v30 = vmul.f32 %v486_v60, %v2051_v17  ;;  %s2666_s18 = sld [smem:[#allocation2 + $0x1d]] }
  0xa9   :  { %873 = vrot.lane.b32.xlu0 %v870_v53, %s1768_s12  ;;  %v477_v25 = vadd.f32 1.0, %v1741_v28  ;;  %v957_v28 = vstv %s2453_s23  ;;  %s2678_s22 = sld [smem:[#allocation2 + $0x5a]] }
  0xaa   :  { %v2382_v23 = vpop.permute.xlu2 %525  ;;  %v470_v6 = vadd.f32 %v469_v35, %v467_v62  ;;  %v909_v35 = vstv %s2387_s14  ;;  %v983_v62 = vstv %s2449_s1  ;;  %s2616_s14 = sld [smem:[#allocation2 + $0x48]] }
  0xab   :  { %v2408_v34 = vmul.f32 0.5, %v477_v25  ;;  %v911_v36 = vmul.f32 %v909_v35, %v2051_v17  ;;  %v910_v47 = vmul.f32 %v909_v35, %v2046_v32  ;;  %s2693_s1 = sld [smem:[#allocation2 + $0x37]] }
  0xac   :  { %v472_v14 = vmul.f32 0.5, %v470_v6  ;;  %s1723_s23 = sld [smem:[#allocation2 + $0x5b]] }
  0xad   :  { %v972_v5 = vmul.f32 %v970_v20, %v2408_v34  ;;  %v946_v48 = vmul.f32 %v944_v13, %v2408_v34  ;;  %v915_v44 = vrot.slane %v911_v36, 2  ;;  %v914_v16 = vrot.slane %v910_v47, 2  ;;  %s2718_s25 = sld [smem:[#allocation2 + $0x20]] }
  0xae   :  { %1742 = vtanh.f32 %v472_v14  ;;  %v1024_v45 = vmul.f32 %v1022_v3, %v2408_v34  ;;  %v998_v1 = vmul.f32 %v996_v11, %v2408_v34  ;;  %v959_v35 = vmul.f32 %v957_v28, %v2408_v34 }
  0xaf   :  { %v530_v36 = vadd.f32 %v2382_v23, %v488_v30 }
  0xb0   :  { %901 = vrot.lane.b32.xlu2 %v899_v4, %s1768_s12  ;;  %871 = vrot.lane.b32.xlu1 %v869_v10, %s1768_s12  ;;  %v598_v10 = vmul.f32 %v596_v15, %v2051_v17 }
  0xb1   :  { %858 = vrot.lane.b32.xlu0 %v855_v12, %s1767_s8 }
  0xb2   :  { %v550_v0 = vpop.permute.xlu2 %549  ;;  %v602_v26 = vrot.slane %v598_v10, 1 }
  0xb4   :  { %v1743_v42 = vpop.eup %1742 }
  0xb5   :  { %v476_v52 = vadd.f32 1.0, %v1743_v42 }
  0xb7   :  { %v2424_v51 = vmul.f32 0.5, %v476_v52 }
  0xb8   :  { %888 = vrot.lane.b32.xlu2 %v885_v29, %s1768_s12  ;;  %856 = vrot.lane.b32.xlu1 %v854_v37, %s1767_s8  ;;  %v618_v29 = vstv %s2455_s24  ;;  %s2712_s24 = sld [smem:[#allocation2 + $0x53]] }
  0xb9   :  { %826 = vrot.lane.b32.xlu0 %v824_v46, %s1767_s8  ;;  %v945_v56 = vmul.f32 %v944_v13, %v2424_v51  ;;  %v971_v7 = vmul.f32 %v970_v20, %v2424_v51  ;;  %v997_v25 = vmul.f32 %v996_v11, %v2424_v51  ;;  %v985_v46 = vmul.f32 %v983_v62, %v2408_v34 }
  0xba   :  { %v565_v49 = vpop.permute.xlu2 %564  ;;  %v511_v24 = vpop.permute.xlu1 %510  ;;  %v619_v20 = vmul.f32 %v618_v29, %v2046_v32  ;;  %v958_v57 = vmul.f32 %v957_v28, %v2424_v51 }
  0xbb   :  { %v498_v2 = vpop.permute.xlu0 %497  ;;  %v516_v63 = vadd.f32 %v511_v24, %v484_v19 }
  0xbc   :  { %v503_v33 = vadd.f32 %v498_v2, %v481_v54  ;;  %v487_v54 = vmul.f32 %v486_v60, %v2046_v32 }
  0xbe   :  { %v2417_v27 = vadd.f32 %v550_v0, %v503_v33  ;;  %v529_v24 = vadd.f32 %v2353_v41, %v487_v54  ;;  %v1092_v41 = vstv %s2481_s26  ;;  %s2728_s26 = sld [smem:[#allocation2 + $0x2f]] }
  0xc0   :  { %977 = vrot.lane.b32.xlu2 %v972_v5, %s1767_s8  ;;  %951 = vrot.lane.b32.xlu1 %v946_v48, %s1767_s8  ;;  %v623_v5 = vrot.slane %v619_v20, 1  ;;  %v1152_v20 = vstv %s2531_s4  ;;  %s2779_s4 = sld [smem:[#allocation2 + $0x23]] }
  0xc1   :  { %918 = vrot.lane.b32.xlu0 %v915_v44, %s1768_s12  ;;  %v984_v44 = vmul.f32 %v983_v62, %v2424_v51 }
  0xc2   :  { %v589_v55 = vpop.permute.xlu2 %588  ;;  %v513_v53 = vpop.permute.xlu1 %512 }
  0xc3   :  { %v517_v21 = vadd.f32 %v513_v53, %v485_v50  ;;  %v500_v39 = vpop.permute.xlu0 %499  ;;  %v1023_v50 = vmul.f32 %v1022_v3, %v2424_v51 }
  0xc4   :  { %v504_v12 = vadd.f32 %v500_v39, %v482_v18  ;;  %v607_v39 = vstv %s2487_s27  ;;  %v1009_v18 = vstv %s2499_s29  ;;  %s2749_s27 = sld [smem:[#allocation2 + $0x56]] }
  0xc5   :  { %v2434_v58 = vadd.f32 %v565_v49, %v517_v21  ;;  %v597_v49 = vmul.f32 %v596_v15, %v2046_v32  ;;  %v631_v21 = vmul.f32 %v629_v9, %v2051_v17  ;;  %s2772_s29 = sld [smem:[#allocation2 + $0x32]] }
  0xc7   :  { %v601_v47 = vrot.slane %v597_v49, 1 }
  0xc8   :  { %949 = vrot.lane.b32.xlu2 %v945_v56, %s1767_s8  ;;  %916 = vrot.lane.b32.xlu1 %v914_v16, %s1768_s12  ;;  %v1094_v56 = vmul.f32 %v1092_v41, %v2408_v34 }
  0xc9   :  { %886 = vrot.lane.b32.xlu0 %v884_v38, %s1768_s12  ;;  %v605_v38 = vadd.f32 %v601_v47, %v2417_v27  ;;  %v1011_v27 = vmul.f32 %v1009_v18, %v2408_v34 }
  0xca   :  { %v650_v40 = vpop.permute.xlu2 %649  ;;  %v2451_v43 = vpop.permute.xlu1 %538 }
  0xcb   :  { %v537_v31 = vpop.permute.xlu0 %536 }
  0xcc   :  { %v542_v61 = vadd.f32 %v537_v31, %v490_v59  ;;  %v609_v59 = vmul.f32 %v607_v39, %v2051_v17  ;;  %v635_v31 = vrot.slane %v631_v21, 1 }
  0xce   :  { %v2463_v4 = vadd.f32 %v589_v55, %v542_v61  ;;  %v491_v55 = vmul.f32 %v489_v8, %v2051_v17  ;;  %v1035_v8 = vstv %s2496_s28  ;;  %v608_v61 = vmul.f32 %v607_v39, %v2046_v32  ;;  %s1700_s28 = sld [smem:[#allocation2 + $0x44]] }
  0xcf   :  { %v1037_v15 = vmul.f32 %v1035_v8, %v2408_v34  ;;  %v613_v10 = vrot.slane %v609_v59, 1 }
  0xd0   :  { %1029 = vrot.lane.b32.xlu2 %v1024_v45, %s1768_s12  ;;  %1003 = vrot.lane.b32.xlu1 %v998_v1, %s1768_s12  ;;  %v543_v3 = vadd.f32 %v2451_v43, %v491_v55 }
  0xd1   :  { %975 = vrot.lane.b32.xlu0 %v971_v7, %s1767_s8  ;;  %v1098_v7 = vrot.slane %v1094_v56, 1 }
  0xd2   :  { %v678_v6 = vpop.permute.xlu2 %677  ;;  %v563_v22 = vpop.permute.xlu1 %562 }
  0xd3   :  { %v2472_v14 = vadd.f32 %v563_v22, %v516_v63  ;;  %v552_v0 = vpop.permute.xlu0 %551  ;;  %v1122_v63 = vstv %s2513_s30  ;;  %s1703_s30 = sld [smem:[#allocation2 + $0x47]] }
  0xd4   :  { %v556_v37 = vadd.f32 %v552_v0, %v504_v12  ;;  %v612_v12 = vrot.slane %v608_v61, 1  ;;  %v1124_v22 = vmul.f32 %v1122_v63, %v2408_v34  ;;  %v1123_v49 = vmul.f32 %v1122_v63, %v2424_v51 }
  0xd5   :  { %v1153_v63 = vmul.f32 %v1152_v20, %v2424_v51 }
  0xd6   :  { %v606_v42 = vadd.f32 %v602_v26, %v556_v37  ;;  %v630_v26 = vmul.f32 %v629_v9, %v2046_v32  ;;  %v616_v0 = vadd.f32 %v612_v12, %v2472_v14  ;;  %v620_v37 = vmul.f32 %v618_v29, %v2051_v17 }
  0xd7   :  { %v1128_v54 = vrot.slane %v1124_v22, 1  ;;  %v1127_v9 = vrot.slane %v1123_v49, 1 }
  0xd8   :  { %1001 = vrot.lane.b32.xlu2 %v997_v25, %s1768_s12  ;;  %990 = vrot.lane.b32.xlu1 %v985_v46, %s1767_s8  ;;  %v2491_v13 = vadd.f32 %v650_v40, %v606_v42  ;;  %v634_v42 = vrot.slane %v630_v26, 1  ;;  %v624_v29 = vrot.slane %v620_v37, 1 }
  0xd9   :  { %964 = vrot.lane.b32.xlu0 %v959_v35, %s1767_s8  ;;  %v1010_v35 = vmul.f32 %v1009_v18, %v2424_v51 }
  0xda   :  { %v695_v2 = vpop.permute.xlu2 %694  ;;  %v578_v33 = vpop.permute.xlu1 %577 }
  0xdb   :  { %v2501_v48 = vadd.f32 %v578_v33, %v530_v36  ;;  %v576_v23 = vpop.permute.xlu0 %575  ;;  %v1154_v36 = vmul.f32 %v1152_v20, %v2408_v34 }
  0xdc   :  { %v581_v52 = vadd.f32 %v576_v23, %v529_v24  ;;  %v638_v24 = vadd.f32 %v634_v42, %v2463_v4 }
  0xdd   :  { %v628_v23 = vadd.f32 %v624_v29, %v2501_v48  ;;  %v1158_v47 = vrot.slane %v1154_v36, 1  ;;  %v1182_v48 = vstv %s2559_s7  ;;  %s2809_s7 = sld [smem:[#allocation2 + $0x5d]] }
  0xde   :  { %v627_v53 = vadd.f32 %v623_v5, %v581_v52  ;;  %v760_v52 = vstv %s2546_s5  ;;  %s2781_s5 = sld [smem:[#allocation2 + $0x35]] }
  0xdf   :  { %v762_v4 = vmul.f32 %v760_v52, %v2051_v17  ;;  %v761_v49 = vmul.f32 %v760_v52, %v2046_v32  ;;  %v1256_v52 = vstv %s2618_s15 }
  0xe0   :  { %988 = vrot.lane.b32.xlu2 %v984_v44, %s1767_s8  ;;  %962 = vrot.lane.b32.xlu1 %v958_v57, %s1767_s8  ;;  %v2518_v16 = vadd.f32 %v678_v6, %v627_v53  ;;  %v617_v6 = vadd.f32 %v613_v10, %v2434_v58  ;;  %v1036_v58 = vmul.f32 %v1035_v8, %v2424_v51  ;;  %v1137_v53 = vstv %s2552_s0  ;;  %s2800_s0 = sld [smem:[#allocation2 + $0x5c]] }
  0xe1   :  { %1027 = vrot.lane.b32.xlu0 %v1023_v50, %s1768_s12  ;;  %v1139_v39 = vmul.f32 %v1137_v53, %v2408_v34  ;;  %v1184_v8 = vmul.f32 %v1182_v48, %v2408_v34  ;;  %v1138_v36 = vmul.f32 %v1137_v53, %v2424_v51  ;;  %v1286_v53 = vstv %s2616_s14 }
  0xe2   :  { %v723_v11 = vpop.permute.xlu2 %722  ;;  %v648_v40 = vpop.permute.xlu1 %647 }
  0xe3   :  { %v2527_v45 = vadd.f32 %v648_v40, %v605_v38  ;;  %v591_v1 = vpop.permute.xlu0 %590  ;;  %v766_v38 = vrot.slane %v762_v4, 2  ;;  %v1143_v18 = vrot.slane %v1139_v39, 1  ;;  %v765_v4 = vrot.slane %v761_v49, 2 }
  0xe4   :  { %v595_v19 = vadd.f32 %v591_v1, %v543_v3  ;;  %v782_v1 = vstv %s2572_s9  ;;  %v1258_v39 = vmul.f32 %v1256_v52, %v2408_v34  ;;  %s2813_s9 = sld [smem:[#allocation2 + $0x59]] }
  0xe6   :  { %v639_v43 = vadd.f32 %v635_v31, %v595_v19 }
  0xe8   :  { %1101 = vrot.lane.b32.xlu2 %v1098_v7, %s1767_s8  ;;  %1042 = vrot.lane.b32.xlu1 %v1037_v15, %s1768_s12  ;;  %v2536_v62 = vadd.f32 %v695_v2, %v639_v43  ;;  %v1093_v2 = vmul.f32 %v1092_v41, %v2424_v51  ;;  %v1107_v41 = vstv %s2555_s6  ;;  %v1188_v7 = vrot.slane %v1184_v8, 1  ;;  %s2804_s6 = sld [smem:[#allocation2 + $0x5e]] }
  0xe9   :  { %1016 = vrot.lane.b32.xlu0 %v1011_v27, %s1768_s12  ;;  %v1109_v56 = vmul.f32 %v1107_v41, %v2408_v34  ;;  %v783_v15 = vmul.f32 %v782_v1, %v2046_v32  ;;  %v771_v27 = vstv %s2579_s10  ;;  %v1183_v43 = vmul.f32 %v1182_v48, %v2424_v51  ;;  %s2834_s10 = sld [smem:[#allocation2 + $0x5f]] }
  0xea   :  { %v740_v28 = vpop.permute.xlu2 %739  ;;  %v665_v60 = vpop.permute.xlu1 %664  ;;  %v1097_v55 = vrot.slane %v1093_v2, 1  ;;  %v773_v10 = vmul.f32 %v771_v27, %v2051_v17  ;;  %v1288_v48 = vmul.f32 %v1286_v53, %v2408_v34  ;;  %v772_v49 = vmul.f32 %v771_v27, %v2046_v32 }
  0xeb   :  { %v2548_v25 = vadd.f32 %v665_v60, %v617_v6  ;;  %v663_v46 = vpop.permute.xlu0 %662  ;;  %v1113_v61 = vrot.slane %v1109_v56, 1  ;;  %v787_v12 = vrot.slane %v783_v15, 2 }
  0xec   :  { %v668_v30 = vadd.f32 %v663_v46, %v616_v0  ;;  %v777_v26 = vrot.slane %v773_v10, 2  ;;  %v1187_v46 = vrot.slane %v1183_v43, 1 }
  0xee   :  { %v2557_v14 = vadd.f32 %v723_v11, %v668_v30 }
  0xf0   :  { %1040 = vrot.lane.b32.xlu2 %v1036_v58, %s1768_s12  ;;  %1014 = vrot.lane.b32.xlu1 %v1010_v35, %s1768_s12  ;;  %v1157_v58 = vrot.slane %v1153_v63, 1  ;;  %v1197_v35 = vstv %s2595_s11 }
  0xf1   :  { %1131 = vrot.lane.b32.xlu0 %v1128_v54, %s1767_s8  ;;  %v1167_v54 = vstv %s2599_s13  ;;  %v1198_v10 = vmul.f32 %v1197_v35, %v2424_v51 }
  0xf2   :  { %v814_v33 = vpop.permute.xlu2 %813  ;;  %v693_v5 = vpop.permute.xlu1 %692 }
  0xf3   :  { %v2570_v44 = vadd.f32 %v693_v5, %v638_v24  ;;  %v680_v57 = vpop.permute.xlu0 %679 }
  0xf4   :  { %v684_v50 = vadd.f32 %v680_v57, %v628_v23 }
  0xf6   :  { %v2581_v21 = vadd.f32 %v740_v28, %v684_v50 }
  0xf8   :  { %1161 = vrot.lane.b32.xlu2 %v1158_v47, %s1768_s12  ;;  %1129 = vrot.lane.b32.xlu1 %v1127_v9, %s1767_s8 }
  0xf9   :  { %1099 = vrot.lane.b32.xlu0 %v1097_v55, %s1767_s8  ;;  %v1142_v55 = vrot.slane %v1138_v36, 1 }
  0xfa   :  { %v842_v59 = vpop.permute.xlu2 %841  ;;  %v710_v3 = vpop.permute.xlu1 %709 }
  0xfb   :  { %v714_v11 = vadd.f32 %v710_v3, %v2491_v13  ;;  %v708_v40 = vpop.permute.xlu0 %707 }
  0xfc   :  { %v2592_v31 = vadd.f32 %v708_v40, %v2527_v45  ;;  %v1108_v45 = vmul.f32 %v1107_v41, %v2424_v51 }
  0xfd   :  { %v770_v19 = vadd.f32 %v766_v38, %v714_v11 }
  0xfe   :  { %v1112_v37 = vrot.slane %v1108_v45, 1 }
  0xff   :  { %v2604_v13 = vadd.f32 %v814_v33, %v770_v19  ;;  %v784_v33 = vmul.f32 %v782_v1, %v2051_v17  ;;  %v1262_v1 = vrot.slane %v1258_v39, 2  ;;  %v1287_v19 = vmul.f32 %v1286_v53, %v2424_v51 }
 0x100   :  { %1146 = vrot.lane.b32.xlu2 %v1143_v18, %s1767_s8  ;;  %1116 = vrot.lane.b32.xlu1 %v1113_v61, %s1767_s8  ;;  %v1292_v61 = vrot.slane %v1288_v48, 2  ;;  %v776_v53 = vrot.slane %v772_v49, 2 }
 0x101   :  { %1191 = vrot.lane.b32.xlu0 %v1188_v7, %s1768_s12  ;;  %v788_v41 = vrot.slane %v784_v33, 2  ;;  %v1257_v7 = vmul.f32 %v1256_v52, %v2424_v51 }
 0x102   :  { %v829_v6 = vpop.permute.xlu2 %828  ;;  %v738_v22 = vpop.permute.xlu1 %737  ;;  %v780_v39 = vadd.f32 %v776_v53, %v2557_v14 }
 0x103   :  { %v743_v28 = vadd.f32 %v738_v22, %v2518_v16  ;;  %v725_v60 = vpop.permute.xlu0 %724  ;;  %v1199_v16 = vmul.f32 %v1197_v35, %v2408_v34  ;;  %v792_v8 = vadd.f32 %v788_v41, %v2581_v21  ;;  %v934_v21 = vstv %s2646_s19 }
 0x104   :  { %v729_v0 = vadd.f32 %v725_v60, %v2548_v25  ;;  %v1169_v25 = vmul.f32 %v1167_v54, %v2408_v34  ;;  %v936_v15 = vmul.f32 %v934_v21, %v2408_v34  ;;  %v1301_v41 = vstv %s2678_s22 }
 0x105   :  { %v791_v30 = vadd.f32 %v787_v12, %v743_v28  ;;  %v1203_v47 = vrot.slane %v1199_v16, 1  ;;  %v1261_v28 = vrot.slane %v1257_v7, 2  ;;  %v1302_v14 = vmul.f32 %v1301_v41, %v2424_v51 }
 0x106   :  { %v781_v42 = vadd.f32 %v777_v26, %v729_v0  ;;  %v1173_v9 = vrot.slane %v1169_v25, 1  ;;  %v1291_v26 = vrot.slane %v1287_v19, 2  ;;  %v1202_v0 = vrot.slane %v1198_v10, 1 }
 0x107   :  { %v847_v20 = vadd.f32 %v842_v59, %v791_v30 }
 0x108   :  { %1114 = vrot.lane.b32.xlu2 %v1112_v37, %s1767_s8  ;;  %1189 = vrot.lane.b32.xlu1 %v1187_v46, %s1768_s12  ;;  %v833_v29 = vadd.f32 %v829_v6, %v781_v42  ;;  %v1271_v37 = vstv %s2654_s20  ;;  %v1346_v46 = vstv %s2656_s21 }
 0x109   :  { %1159 = vrot.lane.b32.xlu0 %v1157_v58, %s1768_s12  ;;  %v1316_v58 = vstv %s2658_s17  ;;  %v1272_v19 = vmul.f32 %v1271_v37, %v2424_v51 }
 0x10a   :  { %v902_v24 = vpop.permute.xlu2 %901  ;;  %v755_v2 = vpop.permute.xlu1 %754 }
 0x10b   :  { %v2630_v5 = vadd.f32 %v902_v24, %v847_v20  ;;  %v2633_v23 = vadd.f32 %v755_v2, %v2536_v62  ;;  %v753_v57 = vpop.permute.xlu0 %752  ;;  %v1168_v62 = vmul.f32 %v1167_v54, %v2424_v51  ;;  %v1273_v54 = vmul.f32 %v1271_v37, %v2408_v34 }
 0x10c   :  { %v2636_v50 = vadd.f32 %v753_v57, %v2570_v44  ;;  %v769_v44 = vadd.f32 %v765_v4, %v2592_v31  ;;  %v793_v31 = vstv %s2640_s16  ;;  %v1318_v20 = vmul.f32 %v1316_v58, %v2408_v34 }
 0x10d   :  { %v1172_v18 = vrot.slane %v1168_v62, 1  ;;  %v795_v12 = vmul.f32 %v793_v31, %v2051_v17  ;;  %v924_v17 = vstv %s2666_s18  ;;  %v794_v16 = vmul.f32 %v793_v31, %v2046_v32 }
 0x10e   :  { %v925_v42 = vmul.f32 %v924_v17, %v2424_v51  ;;  %v1277_v57 = vrot.slane %v1273_v54, 2  ;;  %v1317_v32 = vmul.f32 %v1316_v58, %v2424_v51  ;;  %v1303_v62 = vmul.f32 %v1301_v41, %v2408_v34 }
 0x10f   :  { %v799_v30 = vrot.slane %v795_v12, 2  ;;  %v798_v4 = vrot.slane %v794_v16, 2 }
 0x110   :  { %1206 = vrot.lane.b32.xlu2 %v1203_v47, %s1768_s12  ;;  %1176 = vrot.lane.b32.xlu1 %v1173_v9, %s1768_s12 }
 0x111   :  { %1144 = vrot.lane.b32.xlu0 %v1142_v55, %s1767_s8  ;;  %v803_v36 = vadd.f32 %v799_v30, %v2633_v23  ;;  %v1322_v55 = vrot.slane %v1318_v20, 2  ;;  %v1347_v23 = vmul.f32 %v1346_v46, %v2424_v51  ;;  %v802_v27 = vadd.f32 %v798_v4, %v2636_v50 }
 0x112   :  { %v889_v56 = vpop.permute.xlu2 %888  ;;  %v812_v38 = vpop.permute.xlu1 %811 }
 0x113   :  { %v2652_v59 = vadd.f32 %v889_v56, %v833_v29  ;;  %v817_v3 = vadd.f32 %v812_v38, %v769_v44  ;;  %v844_v11 = vpop.permute.xlu0 %843 }
 0x114   :  { %v848_v40 = vadd.f32 %v844_v11, %v792_v8  ;;  %v1351_v11 = vrot.slane %v1347_v23, 2 }
 0x118   :  { %1174 = vrot.lane.b32.xlu2 %v1172_v18, %s1768_s12  ;;  %1295 = vrot.lane.b32.xlu1 %v1292_v61, %s1767_s8  ;;  %v1307_v18 = vrot.slane %v1303_v62, 2  ;;  %v926_v61 = vmul.f32 %v924_v17, %v2408_v34 }
 0x119   :  { %1265 = vrot.lane.b32.xlu0 %v1262_v1, %s1767_s8  ;;  %v1331_v1 = vstv %s2693_s1 }
 0x11a   :  { %v978_v45 = vpop.permute.xlu2 %977  ;;  %v904_v43 = vpop.permute.xlu1 %903  ;;  %v1333_v50 = vmul.f32 %v1331_v1, %v2408_v34 }
 0x11b   :  { %v908_v63 = vadd.f32 %v904_v43, %v848_v40  ;;  %v874_v6 = vpop.permute.xlu0 %873  ;;  %v1321_v40 = vrot.slane %v1317_v32, 2 }
 0x11c   :  { %v878_v22 = vadd.f32 %v874_v6, %v2604_v13  ;;  %v1348_v13 = vmul.f32 %v1346_v46, %v2408_v34  ;;  %v1306_v6 = vrot.slane %v1302_v14, 2 }
 0x11d   :  { %v938_v60 = vadd.f32 %v936_v15, %v908_v63  ;;  %v1337_v63 = vrot.slane %v1333_v50, 2 }
 0x11e   :  { %v1352_v47 = vrot.slane %v1348_v13, 2  ;;  %v928_v31 = vadd.f32 %v926_v61, %v878_v22  ;;  %v939_v22 = vstv %s2712_s24 }
 0x11f   :  { %v982_v35 = vadd.f32 %v978_v45, %v938_v60  ;;  %v1332_v60 = vmul.f32 %v1331_v1, %v2424_v51  ;;  %v940_v37 = vmul.f32 %v939_v22, %v2424_v51  ;;  %v941_v41 = vmul.f32 %v939_v22, %v2408_v34 }
 0x120   :  { %1293 = vrot.lane.b32.xlu2 %v1291_v26, %s1767_s8  ;;  %1263 = vrot.lane.b32.xlu1 %v1261_v28, %s1767_s8  ;;  %v1276_v26 = vrot.slane %v1272_v19, 2  ;;  %v1361_v28 = vstv %s1723_s23  ;;  %v1081_v1 = vstv %s2749_s27 }
 0x121   :  { %1204 = vrot.lane.b32.xlu0 %v1202_v0, %s1768_s12  ;;  %v1362_v0 = vmul.f32 %v1361_v28, %v2424_v51  ;;  %v1363_v46 = vmul.f32 %v1361_v28, %v2408_v34  ;;  %v1336_v13 = vrot.slane %v1332_v60, 2 }
 0x122   :  { %v950_v25 = vpop.permute.xlu2 %949  ;;  %v872_v29 = vpop.permute.xlu1 %871 }
 0x123   :  { %v877_v24 = vadd.f32 %v872_v29, %v817_v3  ;;  %v859_v2 = vpop.permute.xlu0 %858  ;;  %v1366_v20 = vrot.slane %v1362_v0, 2 }
 0x124   :  { %v863_v33 = vadd.f32 %v859_v2, %v803_v36  ;;  %v935_v36 = vmul.f32 %v934_v21, %v2424_v51 }
 0x125   :  { %v927_v9 = vadd.f32 %v925_v42, %v877_v24  ;;  %v1048_v42 = vstv %s2718_s25 }
 0x126   :  { %v1050_v29 = vmul.f32 %v1048_v42, %v2408_v34 }
 0x127   :  { %v955_v52 = vadd.f32 %v950_v25, %v927_v9  ;;  %v1367_v25 = vrot.slane %v1363_v46, 2 }
 0x128   :  { %1280 = vrot.lane.b32.xlu2 %v1277_v57, %s1767_s8  ;;  %1355 = vrot.lane.b32.xlu1 %v1352_v47, %s1768_s12  ;;  %v1054_v24 = vrot.slane %v1050_v29, 1  ;;  %v937_v57 = vadd.f32 %v935_v36, %v2630_v5 }
 0x129   :  { %1325 = vrot.lane.b32.xlu0 %v1322_v55, %s1768_s12  ;;  %v929_v55 = vstv %s2728_s26 }
 0x12a   :  { %v1030_v48 = vpop.permute.xlu2 %1029  ;;  %v857_v44 = vpop.permute.xlu1 %856  ;;  %v931_v21 = vmul.f32 %v929_v55, %v2408_v34 }
 0x12b   :  { %v2704_v56 = vadd.f32 %v1030_v48, %v982_v35  ;;  %v862_v38 = vadd.f32 %v857_v44, %v802_v27  ;;  %v827_v8 = vpop.permute.xlu0 %826 }
 0x12c   :  { %v832_v3 = vadd.f32 %v827_v8, %v780_v39  ;;  %v933_v62 = vadd.f32 %v931_v21, %v2652_v59  ;;  %v1083_v59 = vmul.f32 %v1081_v1, %v2408_v34 }
 0x12e   :  { %v1087_v50 = vrot.slane %v1083_v59, 1 }
 0x130   :  { %1353 = vrot.lane.b32.xlu2 %v1351_v11, %s1768_s12  ;;  %1323 = vrot.lane.b32.xlu1 %v1321_v40, %s1768_s12 }
 0x131   :  { %1310 = vrot.lane.b32.xlu0 %v1307_v18, %s1767_s8 }
 0x132   :  { %v1002_v7 = vpop.permute.xlu2 %1001  ;;  %v952_v15 = vpop.permute.xlu1 %951 }
 0x133   :  { %v2716_v10 = vadd.f32 %v1002_v7, %v955_v52  ;;  %v956_v45 = vadd.f32 %v952_v15, %v928_v31  ;;  %v919_v43 = vpop.permute.xlu0 %918 }
 0x134   :  { %v923_v12 = vadd.f32 %v919_v43, %v863_v33 }
 0x136   :  { %v943_v23 = vadd.f32 %v941_v41, %v923_v12 }
 0x138   :  { %1340 = vrot.lane.b32.xlu2 %v1337_v63, %s1768_s12  ;;  %1308 = vrot.lane.b32.xlu1 %v1306_v6, %s1767_s8 }
 0x139   :  { %1278 = vrot.lane.b32.xlu0 %v1276_v26, %s1767_s8 }
 0x13a   :  { %v989_v30 = vpop.permute.xlu2 %988  ;;  %v917_v58 = vpop.permute.xlu1 %916 }
 0x13b   :  { %v922_v35 = vadd.f32 %v917_v58, %v862_v38  ;;  %v887_v17 = vpop.permute.xlu0 %886  ;;  %v930_v38 = vmul.f32 %v929_v55, %v2424_v51  ;;  %v1049_v55 = vmul.f32 %v1048_v42, %v2424_v51 }
 0x13c   :  { %v892_v54 = vadd.f32 %v887_v17, %v832_v3 }
 0x13d   :  { %v942_v16 = vadd.f32 %v940_v37, %v922_v35  ;;  %v1053_v42 = vrot.slane %v1049_v55, 1 }
 0x13e   :  { %v932_v8 = vadd.f32 %v930_v38, %v892_v54  ;;  %v1059_v54 = vstv %s2772_s29 }
 0x13f   :  { %v994_v49 = vadd.f32 %v989_v30, %v942_v16 }
 0x140   :  { %1338 = vrot.lane.b32.xlu1 %v1336_v13, %s1768_s12  ;;  %1368 = vrot.lane.b32.xlu2 %v1366_v20, %s1768_s12  ;;  %v1070_v13 = vstv %s1700_s28 }
 0x141   :  { %1370 = vrot.lane.b32.xlu0 %v1367_v25, %s1768_s12  ;;  %v1072_v16 = vmul.f32 %v1070_v13, %v2408_v34  ;;  %v1061_v25 = vmul.f32 %v1059_v54, %v2408_v34  ;;  %v1071_v29 = vmul.f32 %v1070_v13, %v2424_v51 }
 0x142   :  { %v1102_v2 = vpop.permute.xlu2 %1101  ;;  %v1004_v33 = vpop.permute.xlu1 %1003 }
 0x143   :  { %v1008_v47 = vadd.f32 %v1004_v33, %v956_v45  ;;  %v976_v9 = vpop.permute.xlu0 %975 }
 0x144   :  { %v981_v4 = vadd.f32 %v976_v9, %v937_v57  ;;  %v1075_v57 = vrot.slane %v1071_v29, 1  ;;  %v1212_v9 = vstv %s2779_s4  ;;  %v1376_v29 = vstv %s2800_s0 }
 0x145   :  { %v1058_v53 = vadd.f32 %v1054_v24, %v1008_v47  ;;  %v1076_v24 = vrot.slane %v1072_v16, 1  ;;  %v1234_v47 = vstv %s1703_s30 }
 0x147   :  { %v2744_v52 = vadd.f32 %v1102_v2, %v1058_v53  ;;  %v1065_v2 = vrot.slane %v1061_v25, 1  ;;  %v1080_v53 = vadd.f32 %v1076_v24, %v2704_v56  ;;  %v1060_v24 = vmul.f32 %v1059_v54, %v2424_v51 }
 0x14a   :  { %v1041_v32 = vpop.permute.xlu2 %1040  ;;  %v991_v27 = vpop.permute.xlu1 %990 }
 0x14b   :  { %v2747_v48 = vadd.f32 %v1041_v32, %v994_v49  ;;  %v995_v44 = vadd.f32 %v991_v27, %v943_v23  ;;  %v965_v5 = vpop.permute.xlu0 %964  ;;  %v1236_v23 = vmul.f32 %v1234_v47, %v2408_v34  ;;  %v1235_v27 = vmul.f32 %v1234_v47, %v2424_v51 }
 0x14c   :  { %v969_v39 = vadd.f32 %v965_v5, %v933_v62 }
 0x152   :  { %v2752_v3 = vpop.permute.xlu2 %1161  ;;  %v963_v11 = vpop.permute.xlu1 %962 }
 0x153   :  { %v968_v40 = vadd.f32 %v963_v11, %v932_v8  ;;  %v1028_v18 = vpop.permute.xlu0 %1027 }
 0x154   :  { %v1033_v61 = vadd.f32 %v1028_v18, %v981_v4  ;;  %v1223_v4 = vstv %s2781_s5  ;;  %v1240_v18 = vrot.slane %v1236_v23, 2  ;;  %v1245_v23 = vstv %s2813_s9 }
 0x155   :  { %v1225_v21 = vmul.f32 %v1223_v4, %v2408_v34  ;;  %v1246_v54 = vmul.f32 %v1245_v23, %v2424_v51 }
 0x156   :  { %v1079_v32 = vadd.f32 %v1075_v57, %v1033_v61  ;;  %v1166_v61 = vadd.f32 %v2752_v3, %v2744_v52 }
 0x157   :  { %v1229_v56 = vrot.slane %v1225_v21, 2 }
 0x15a   :  { %v1147_v14 = vpop.permute.xlu2 %1146  ;;  %v1043_v31 = vpop.permute.xlu1 %1042 }
 0x15b   :  { %v1047_v19 = vadd.f32 %v1043_v31, %v995_v44  ;;  %v1017_v7 = vpop.permute.xlu0 %1016  ;;  %v1214_v44 = vmul.f32 %v1212_v9, %v2408_v34 }
 0x15c   :  { %v1021_v49 = vadd.f32 %v1017_v7, %v969_v39  ;;  %v1213_v7 = vmul.f32 %v1212_v9, %v2424_v51  ;;  %v1397_v9 = vstv %s2809_s7 }
 0x15d   :  { %v1091_v15 = vadd.f32 %v1087_v50, %v1047_v19  ;;  %v1239_v50 = vrot.slane %v1235_v27, 2  ;;  %v1218_v31 = vrot.slane %v1214_v44, 2  ;;  %v1082_v19 = vmul.f32 %v1081_v1, %v2424_v51 }
 0x15e   :  { %v1069_v41 = vadd.f32 %v1065_v2, %v1021_v49  ;;  %v1418_v2 = vstv %s2804_s6 }
 0x15f   :  { %v2758_v45 = vadd.f32 %v1147_v14, %v1091_v15  ;;  %v1057_v15 = vadd.f32 %v1053_v42, %v2716_v10  ;;  %v1222_v52 = vadd.f32 %v1218_v31, %v1166_v61 }
 0x162   :  { %v2760_v43 = vpop.permute.xlu2 %1114  ;;  %v1015_v12 = vpop.permute.xlu1 %1014 }
 0x163   :  { %v2762_v63 = vadd.f32 %v1015_v12, %v968_v40  ;;  %v1132_v6 = vpop.permute.xlu0 %1131 }
 0x164   :  { %v1136_v5 = vadd.f32 %v1132_v6, %v1080_v53 }
 0x16a   :  { %v2764_v26 = vpop.permute.xlu2 %1206  ;;  %v1130_v28 = vpop.permute.xlu1 %1129 }
 0x16b   :  { %v2766_v22 = vpop.permute.xlu0 %1099  ;;  %v1135_v38 = vadd.f32 %v1130_v28, %v1079_v32 }
 0x16c   :  { %v1105_v3 = vadd.f32 %v2766_v22, %v1057_v15 }
 0x172   :  { %v2768_v60 = vpop.permute.xlu2 %1174  ;;  %v1117_v0 = vpop.permute.xlu1 %1116 }
 0x173   :  { %v1192_v37 = vpop.permute.xlu0 %1191  ;;  %v1121_v39 = vadd.f32 %v1117_v0, %v1069_v41 }
 0x174   :  { %v1196_v11 = vadd.f32 %v1192_v37, %v1136_v5  ;;  %v1086_v37 = vrot.slane %v1082_v19, 1 }
 0x176   :  { %v1244_v6 = vadd.f32 %v1240_v18, %v1196_v11 }
 0x17a   :  { %v1190_v46 = vpop.permute.xlu1 %1189  ;;  %v2774_v58 = vpop.permute.xlu2 %1293 }
 0x17b   :  { %v2770_v30 = vpop.permute.xlu0 %1159  ;;  %v1195_v14 = vadd.f32 %v1190_v46, %v1135_v38 }
 0x17c   :  { %v1165_v10 = vadd.f32 %v2770_v30, %v1105_v3  ;;  %v1064_v30 = vrot.slane %v1060_v24, 1 }
 0x17d   :  { %v1243_v28 = vadd.f32 %v1239_v50, %v1195_v14  ;;  %v1247_v50 = vmul.f32 %v1245_v23, %v2408_v34  ;;  %v1211_v34 = vadd.f32 %v2764_v26, %v2758_v45 }
 0x17f   :  { %v1299_v22 = vadd.f32 %v2774_v58, %v1243_v28 }
 0x182   :  { %v1177_v35 = vpop.permute.xlu1 %1176  ;;  %v1281_v20 = vpop.permute.xlu2 %1280 }
 0x183   :  { %v2776_v17 = vpop.permute.xlu0 %1144  ;;  %v1181_v40 = vadd.f32 %v1177_v35, %v1121_v39  ;;  %v1217_v35 = vrot.slane %v1213_v7, 2 }
 0x185   :  { %v1233_v12 = vadd.f32 %v1229_v56, %v1181_v40  ;;  %v1221_v53 = vadd.f32 %v1217_v35, %v1165_v10  ;;  %v1250_v40 = vrot.slane %v1246_v54, 2 }
 0x187   :  { %v1285_v16 = vadd.f32 %v1281_v20, %v1233_v12  ;;  %v1090_v20 = vadd.f32 %v1086_v37, %v2747_v48  ;;  %v1068_v48 = vadd.f32 %v1064_v30, %v2762_v63 }
 0x189   :  { %v1120_v14 = vadd.f32 %v2760_v43, %v1068_v48  ;;  %v1439_v43 = vstv %s2834_s10 }
 0x18a   :  { %v1296_v36 = vpop.permute.xlu1 %1295  ;;  %v1354_v62 = vpop.permute.xlu2 %1353 }
 0x18b   :  { %v1266_v33 = vpop.permute.xlu0 %1265  ;;  %v1300_v0 = vadd.f32 %v1296_v36, %v1244_v6  ;;  %v1359_v47 = vadd.f32 %v1354_v62, %v1299_v22  ;;  %v1150_v62 = vadd.f32 %v2776_v17, %v1090_v20  ;;  %v1224_v17 = vmul.f32 %v1223_v4, %v2424_v51 }
 0x18c   :  { %v1270_v1 = vadd.f32 %v1266_v33, %v1222_v52  ;;  %v1251_v51 = vrot.slane %v1247_v50, 2 }
 0x18d   :  { %v1419_v58 = vadd.f32 %v1418_v2, %v1359_v47  ;;  %v1228_v28 = vrot.slane %v1224_v17, 2 }
 0x18e   :  { %v1255_v37 = vadd.f32 %v1251_v51, %v1211_v34 }
 0x18f   :  { %v1423_v18 = vrot.slane %v1419_v58, 1 }
 0x191   :  { %v1427_v15 = vmax.f32 %v1419_v58, %v1423_v18 }
 0x192   :  { %v1264_v8 = vpop.permute.xlu1 %1263  ;;  %v1341_v46 = vpop.permute.xlu2 %1340 }
 0x193   :  { %v1205_v59 = vpop.permute.xlu0 %1204  ;;  %v1345_v57 = vadd.f32 %v1341_v46, %v1285_v16  ;;  %v1269_v27 = vadd.f32 %v1264_v8, %v1221_v53 }
 0x194   :  { %v1210_v11 = vadd.f32 %v1205_v59, %v1150_v62  ;;  %v1180_v59 = vadd.f32 %v2768_v60, %v1120_v14 }
 0x195   :  { %v1399_v32 = vadd.f32 %v1397_v9, %v1345_v57 }
 0x196   :  { %v1254_v31 = vadd.f32 %v1250_v40, %v1210_v11  ;;  %v1232_v3 = vadd.f32 %v1228_v28, %v1180_v59  ;;  %v1769_v11 = vmov 0  }
 0x197   :  { %v1403_v8 = vrot.slane %v1399_v32, 1  ;;  %1735 = vset.pattern.permute.xlu0 %v1769_v11  ;;  %1734 = vset.pattern.permute.xlu2 %v1769_v11 }
 0x198   :  { %1733 = vset.pattern.permute.xlu1 %v1769_v11 }
 0x199   :  { %v1407_v63 = vmax.f32 %v1399_v32, %v1403_v8 }
 0x19a   :  { %v1356_v13 = vpop.permute.xlu1 %1355  ;;  %v1369_v12 = vpop.permute.xlu2 %1368 }
 0x19b   :  { %v1360_v25 = vadd.f32 %v1356_v13, %v1300_v0  ;;  %v1326_v49 = vpop.permute.xlu0 %1325 }
 0x19c   :  { %v1330_v36 = vadd.f32 %v1326_v49, %v1270_v1 }
 0x19d   :  { %v1420_v33 = vadd.f32 %v1418_v2, %v1360_v25 }
 0x19e   :  { %v1378_v55 = vadd.f32 %v1376_v29, %v1330_v36 }
 0x19f   :  { %v1424_v41 = vrot.slane %v1420_v33, 1 }
 0x1a0   :  { %v1382_v21 = vrot.slane %v1378_v55, 1 }
 0x1a1   :  { %v2826_v44 = vmax.f32 %v1420_v33, %v1424_v41 }
 0x1a2   :  { %v1324_v5 = vpop.permute.xlu1 %1323  ;;  %v1386_v39 = vmax.f32 %v1378_v55, %v1382_v21 }
 0x1a3   :  { %v1329_v38 = vadd.f32 %v1324_v5, %v1269_v27  ;;  %v1311_v42 = vpop.permute.xlu0 %1310  ;;  %1433 = vrot.lane.b32.xlu1 %v2826_v44, %s1767_s8 }
 0x1a4   :  { %1391 = vrot.lane.b32.xlu0 %v1386_v39, %s1767_s8  ;;  %v1315_v46 = vadd.f32 %v1311_v42, %v1255_v37 }
 0x1a5   :  { %v1377_v56 = vadd.f32 %v1376_v29, %v1329_v38 }
 0x1a7   :  { %v1381_v61 = vrot.slane %v1377_v56, 1 }
 0x1a9   :  { %v1385_v19 = vmax.f32 %v1377_v56, %v1381_v61 }
 0x1aa   :  { %v1309_v7 = vpop.permute.xlu1 %1308 }
 0x1ab   :  { %v1314_v6 = vadd.f32 %v1309_v7, %v1254_v31  ;;  %v1279_v52 = vpop.permute.xlu0 %1278  ;;  %1412 = vrot.lane.b32.xlu1 %v1407_v63, %s1767_s8  ;;  %1389 = vrot.lane.b32.xlu2 %v1385_v19, %s1767_s8 }
 0x1ac   :  { %1431 = vrot.lane.b32.xlu0 %v1427_v15, %s1767_s8  ;;  %v1284_v1 = vadd.f32 %v1279_v52, %v1232_v3 }
 0x1ad   :  { %v1374_v4 = vadd.f32 %v1369_v12, %v1314_v6 }
 0x1af   :  { %v1440_v0 = vadd.f32 %v1439_v43, %v1374_v4 }
 0x1b1   :  { %v1444_v60 = vrot.slane %v1440_v0, 1 }
 0x1b2   :  { %v1339_v35 = vpop.permute.xlu1 %1338 }
 0x1b3   :  { %v1344_v13 = vadd.f32 %v1339_v35, %v1284_v1  ;;  %v1371_v10 = vpop.permute.xlu0 %1370  ;;  %v1448_v16 = vmax.f32 %v1440_v0, %v1444_v60 }
 0x1b4   :  { %v1375_v25 = vadd.f32 %v1371_v10, %v1315_v46 }
 0x1b5   :  { %v1398_v29 = vadd.f32 %v1397_v9, %v1344_v13  ;;  %1452 = vrot.lane.b32.xlu1 %v1448_v16, %s1767_s8 }
 0x1b6   :  { %v1441_v45 = vadd.f32 %v1439_v43, %v1375_v25 }
 0x1b7   :  { %v1402_v26 = vrot.slane %v1398_v29, 1 }
 0x1b8   :  { %v1445_v49 = vrot.slane %v1441_v45, 1 }
 0x1b9   :  { %v1406_v24 = vmax.f32 %v1398_v29, %v1402_v26 }
 0x1ba   :  { %v1449_v2 = vmax.f32 %v1441_v45, %v1445_v49 }
 0x1bb   :  { %1410 = vrot.lane.b32.xlu0 %v1406_v24, %s1767_s8 }
 0x1bc   :  { %1454 = vrot.lane.b32.xlu2 %v1449_v2, %s1767_s8 }
 0x205   :  { %v1390_v22 = vpop.permute.xlu2 %1389 }
 0x206   :  { %v1395_v36 = vmax.f32 %v1385_v19, %v1390_v22 }
 0x208   :  { %v1462_v57 = vrot.slane %v1395_v36, 7 }
 0x20a   :  { %1464 = vrot.lane.b32.xlu1 %v1462_v57, %s1768_s12 }
 0x215   :  { %v1434_v33 = vpop.permute.xlu1 %1433 }
 0x216   :  { %v1438_v47 = vmax.f32 %v2826_v44, %v1434_v33  ;;  %v1392_v9 = vpop.permute.xlu0 %1391  ;;  %v1455_v55 = vpop.permute.xlu2 %1454 }
 0x217   :  { %v1396_v53 = vmax.f32 %v1386_v39, %v1392_v9  ;;  %v1459_v41 = vmax.f32 %v1449_v2, %v1455_v55 }
 0x218   :  { %v1487_v30 = vrot.slane %v1438_v47, 7 }
 0x219   :  { %v1501_v20 = vrot.slane %v1459_v41, 3  ;;  %v1463_v21 = vrot.slane %v1396_v53, 7  ;;  %v1497_v12 = vrot.slane %v1459_v41, 4 }
 0x21a   :  { %1490 = vrot.lane.b32.xlu0 %v1487_v30, %s1768_s12 }
 0x21b   :  { %1466 = vrot.lane.b32.xlu2 %v1463_v21, %s1768_s12  ;;  %1504 = vrot.lane.b32.xlu1 %v1501_v20, %s1768_s12 }
 0x21d   :  { %v1413_v23 = vpop.permute.xlu1 %1412 }
 0x21e   :  { %v1417_v32 = vmax.f32 %v1407_v63, %v1413_v23  ;;  %v1432_v27 = vpop.permute.xlu0 %1431 }
 0x21f   :  { %v1437_v54 = vmax.f32 %v1427_v15, %v1432_v27 }
 0x220   :  { %v1477_v58 = vrot.slane %v1417_v32, 3  ;;  %v1473_v37 = vrot.slane %v1417_v32, 4 }
 0x221   :  { %v1486_v5 = vrot.slane %v1437_v54, 7 }
 0x222   :  { %1480 = vrot.lane.b32.xlu0 %v1477_v58, %s1768_s12 }
 0x223   :  { %1488 = vrot.lane.b32.xlu2 %v1486_v5, %s1768_s12  ;;  %v1560_v5 = vld [vmem:[%s2910_s2 + $0x8] sm:$0xff] }
 0x227   :  { %v1453_v44 = vpop.permute.xlu1 %1452 }
 0x228   :  { %v2858_v39 = vmax.f32 %v1448_v16, %v1453_v44 }
 0x22a   :  { %v1500_v62 = vrot.slane %v2858_v39, 3  ;;  %v1496_v57 = vrot.slane %v2858_v39, 4 }
 0x22c   :  { %1502 = vrot.lane.b32.xlu0 %v1500_v62, %s1768_s12  ;;  %v1559_v62 = vld [vmem:[%s2910_s2] sm:$0xff] }
 0x22d   :  { %v1411_v38 = vpop.permute.xlu0 %1410 }
 0x22e   :  { %v1416_v42 = vmax.f32 %v1406_v24, %v1411_v38 }
 0x230   :  { %v1476_v48 = vrot.slane %v1416_v42, 3  ;;  %v1472_v50 = vrot.slane %v1416_v42, 4 }
 0x232   :  { %1478 = vrot.lane.b32.xlu2 %v1476_v48, %s1768_s12 }
 0x275   :  { %v1467_v8 = vpop.permute.xlu2 %1466 }
 0x276   :  { %v1510_v14 = vsel %vm1508_vm0, %v1396_v53, %v1467_v8 }
 0x277   :  { %v1513_v59 = vsel %vm1511_vm1, %v1510_v14, %v1396_v53 }
 0x278   :  { %v1516_v3 = vsel %vm1514_vm2, %v1513_v59, %v1467_v8 }
 0x279   :  { %v1519_v13 = vsel %vm1517_vm4, %v1516_v3, %v1473_v37 }
 0x27c   :  { %v1465_v56 = vpop.permute.xlu1 %1464 }
 0x27d   :  { %v1509_v40 = vsel %vm1508_vm0, %v1395_v36, %v1465_v56  ;;  %v1489_v18 = vpop.permute.xlu2 %1488 }
 0x27e   :  { %v1512_v61 = vsel %vm1511_vm1, %v1509_v40, %v1395_v36  ;;  %v1529_v10 = vsel %vm1508_vm0, %v1437_v54, %v1489_v18 }
 0x27f   :  { %v1515_v17 = vsel %vm1514_vm2, %v1512_v61, %v1465_v56  ;;  %v1531_v26 = vsel %vm1511_vm1, %v1529_v10, %v1437_v54 }
 0x280   :  { %v1518_v63 = vsel %vm1517_vm4, %v1515_v17, %v1472_v50  ;;  %v1533_v2 = vsel %vm1514_vm2, %v1531_v26, %v1489_v18 }
 0x281   :  { %v1535_v9 = vsel %vm1517_vm4, %v1533_v2, %v1496_v57 }
 0x28c   :  { %v1491_v31 = vpop.permute.xlu0 %1490  ;;  %v1479_v19 = vpop.permute.xlu2 %1478 }
 0x28d   :  { %v1530_v7 = vsel %vm1508_vm0, %v1438_v47, %v1491_v31  ;;  %v1521_v15 = vsel %vm1520_vm3, %v1518_v63, %v1479_v19  ;;  %v1505_v51 = vpop.permute.xlu1 %1504 }
 0x28e   :  { %v1532_v6 = vsel %vm1511_vm1, %v1530_v7, %v1438_v47  ;;  %v1524_v28 = vsel %vm1523_vm5, %v1521_v15, %v1472_v50  ;;  %v1561_v7 = vld [vmem:[%s2910_s2 + $0x10] sm:$0x3]  ;;  %s1728_s2 = sld [smem:[#allocation2 + $0x60]] }
 0x28f   :  { %v1534_v52 = vsel %vm1514_vm2, %v1532_v6, %v1491_v31  ;;  %v1527_v34 = vsel %vm1526_vm6, %v1524_v28, %v1479_v19  ;;  %v1605_v28 = vperm.slane %v1561_v7, 0 }
 0x290   :  { %v1536_v43 = vsel %vm1517_vm4, %v1534_v52, %v1497_v12  ;;  %v1543_v4 = vmul.f32 0.5, %v1527_v34 }
 0x291   :  { %v1538_v0 = vsel %vm1520_vm3, %v1536_v43, %v1505_v51 }
 0x292   :  { %v1540_v1 = vsel %vm1523_vm5, %v1538_v0, %v1497_v12  ;;  %1744 = vtanh.f32 %v1543_v4  ;;  %v1610_v0 = vperm.slane %v1561_v7, 1 }
 0x293   :  { %v1542_v60 = vsel %vm1526_vm6, %v1540_v1, %v1505_v51 }
 0x294   :  { %v1546_v46 = vmul.f32 0.5, %v1542_v60  ;;  %v1481_v35 = vpop.permute.xlu0 %1480 }
 0x295   :  { %v1522_v16 = vsel %vm1520_vm3, %v1519_v13, %v1481_v35 }
 0x296   :  { %1746 = vtanh.f32 %v1546_v46  ;;  %v1525_v25 = vsel %vm1523_vm5, %v1522_v16, %v1473_v37 }
 0x297   :  { %v1528_v29 = vsel %vm1526_vm6, %v1525_v25, %v1481_v35  ;;  %v1623_v25 = vstv %s1728_s2 }
 0x298   :  { %v1745_v45 = vpop.eup %1744  ;;  %v1545_v49 = vmul.f32 0.5, %v1528_v29 }
 0x299   :  { %v1551_v24 = vadd.f32 1.0, %v1745_v45 }
 0x29a   :  { %1748 = vtanh.f32 %v1545_v49 }
 0x29b   :  { %v1555_v22 = vmul.f32 0.5, %v1551_v24 }
 0x29c   :  { %v1747_v36 = vpop.eup %1746 }
 0x29d   :  { %v1554_v33 = vadd.f32 1.0, %v1747_v36  ;;  %1564 = vperm.xlu0 %1735, %v1555_v22  }
 0x29e   :  { %v1503_v47 = vpop.permute.xlu0 %1502 }
 0x29f   :  { %v1537_v55 = vsel %vm1520_vm3, %v1535_v9, %v1503_v47  ;;  %v1558_v53 = vmul.f32 0.5, %v1554_v33 }
 0x2a0   :  { %v1749_v41 = vpop.eup %1748  ;;  %v1539_v30 = vsel %vm1523_vm5, %v1537_v55, %v1496_v57 }
 0x2a1   :  { %v1553_v20 = vadd.f32 1.0, %v1749_v41  ;;  %v1541_v21 = vsel %vm1526_vm6, %v1539_v30, %v1503_v47  ;;  %1579 = vperm.xlu2 %1734, %v1558_v53  }
 0x2a2   :  { %v1544_v23 = vmul.f32 0.5, %v1541_v21 }
 0x2a3   :  { %v1557_v32 = vmul.f32 0.5, %v1553_v20 }
 0x2a4   :  { %1750 = vtanh.f32 %v1544_v23 }
 0x2a5   :  { %1574 = vperm.xlu1 %1733, %v1557_v32  }
 0x2aa   :  { %v1751_v27 = vpop.eup %1750 }
 0x2ab   :  { %v1552_v54 = vadd.f32 1.0, %v1751_v27 }
 0x2ad   :  { %v1556_v58 = vmul.f32 0.5, %v1552_v54 }
 0x2af   :  { %1569 = vperm.xlu1 %1733, %v1556_v58  }
 0x2fb   :  { %v1580_v44 = vpop.permute.xlu2 %1579 }
 0x2fc   :  { %v1585_v39 = vmul.f32 %v1580_v44, %v1560_v5 }
 0x2fe   :  { %v1597_v48 = vsel %vm1586_vm7, %v1585_v39, 0.0 }
 0x30f   :  { %v1565_v56 = vpop.permute.xlu0 %1564 }
 0x310   :  { %v1582_v61 = vmul.f32 %v1565_v56, %v1559_v62 }
 0x312   :  { %v1587_v63 = vsel %vm1586_vm7, %v1582_v61, 0.0 }
 0x317   :  { %v1575_v38 = vpop.permute.xlu1 %1574 }
 0x318   :  { %v1584_v42 = vmul.f32 %v1575_v38, %v1559_v62 }
 0x31a   :  { %v1596_v8 = vsel %vm1586_vm7, %v1584_v42, 0.0 }
 0x31b   :  { %v1598_v11 = vadd.f32 %v1597_v48, %v1596_v8 }
 0x31d   :  { %v1599_v40 = vrot.slane %v1598_v11, 4 }
 0x31f   :  { %v1600_v18 = vadd.f32 %v1599_v40, %v1598_v11 }
 0x321   :  { %v1601_v17 = vrot.slane %v1600_v18, 2  ;;  %v1570_v50 = vpop.permute.xlu1 %1569 }
 0x322   :  { %v1583_v14 = vmul.f32 %v1570_v50, %v1560_v5 }
 0x323   :  { %v1602_v31 = vadd.f32 %v1601_v17, %v1600_v18 }
 0x324   :  { %v1588_v19 = vsel %vm1586_vm7, %v1583_v14, 0.0 }
 0x325   :  { %v1603_v15 = vrot.slane %v1602_v31, 1  ;;  %v1589_v12 = vadd.f32 %v1588_v19, %v1587_v63 }
 0x327   :  { %v1604_v59 = vadd.f32 %v1603_v15, %v1602_v31  ;;  %v1590_v6 = vrot.slane %v1589_v12, 4 }
 0x329   :  { %v1591_v52 = vadd.f32 %v1590_v6, %v1589_v12  ;;  %v1607_v51 = vadd.f32 %v1605_v28, %v1604_v59 }
 0x32b   :  { %v1592_v34 = vrot.slane %v1591_v52, 2  ;;  %v1609_v3 = vmax.f32 %v1607_v51, 0.0 }
 0x32d   :  { %v1593_v43 = vadd.f32 %v1592_v34, %v1591_v52  ;;  %v1612_v60 = vmul.f32 %v1610_v0, %v1609_v3 }
 0x32f   :  { %v1594_v4 = vrot.slane %v1593_v43, 1  ;;  %v1615_v13 = vrot.slane %v1612_v60, 7 }
 0x331   :  { %v1595_v37 = vadd.f32 %v1594_v4, %v1593_v43 }
 0x333   :  { %v1606_v1 = vadd.f32 %v1605_v28, %v1595_v37 }
 0x335   :  { %v1608_v46 = vmax.f32 %v1606_v1, 0.0 }
 0x337   :  { %v1611_v35 = vmul.f32 %v1610_v0, %v1608_v46 }
 0x339   :  { %v1617_v10 = vsel %vm1616_vm8, %v1615_v13, %v1611_v35 }
 0x33a   :  { %v1620_v16 = vsel %vm1619_vm9, %v1617_v10, 0.0 }
 0x33b   :  { %1621 = vadd.xlane.f32.xlu2 %v1620_v16 }
 0x3ae   :  { %v1622_v29 = vpop.xlane.xlu2 %1621 }
 0x3af   :  { %v1624_v45 = vadd.f32 %v1623_v25, %v1622_v29 }
 0x3b1   :  { %v1625_v26 = vmax.f32 %v1624_v45, 0.0 }
 0x3b3   :  { %1627 = vst.msk [vmem:[%s2911_s3] sm:$0x3] %vm1626_vm10, %v1625_v26 }
 0x3b4   :  { %1632 = vsyncpa [#allocation3], 1 }

</bundles_post_ra>
